<compile_context>
chip_gen: v5e
topology: v5e:2x2
jax: 0.10.0
libtpu: 0.0.40
codegen_flags: <defaults>
</compile_context>

<pallas_src>
import functools

import jax
import jax.numpy as jnp
from jax.experimental import pallas as pl
from jax.experimental.pallas import tpu as pltpu


_VMEM_LIMIT = 32 * 1024 * 1024  # explicit VMEM budget (safe on v5e/v6e/v7x)


def _pick_tile(n, candidates=(1024, 512, 256, 128, 64, 32, 16, 8)):
    """Largest candidate tile that divides n (falls back to the full extent)."""
    for c in candidates:
        if n % c == 0:
            return c
    return n


# -----------------------------------------------------------------------------
# Kernels
# -----------------------------------------------------------------------------
def _proj_kernel(*refs, n_in, gate_w):
    """Hoisted input projection for one biLSTM layer (both directions, 4 gates).

    refs = x_refs[n_in] (rows, D_i), w_refs[n_in] (D_i, 8H) bf16, b_ref (1, 8H),
           out_fwd (rows, 4H), out_bwd (rows, 4H).
    Computes sum_i x_i @ W_i + b with bf16 operands / f32 accumulation and
    splits the fused [fwd | bwd] gate pre-activations into the two outputs.
    """
    x_refs = refs[:n_in]
    w_refs = refs[n_in:2 * n_in]
    b_ref = refs[2 * n_in]
    of_ref = refs[2 * n_in + 1]
    ob_ref = refs[2 * n_in + 2]

    total = None
    for x_ref, w_ref in zip(x_refs, w_refs):
        part = jnp.dot(x_ref[...].astype(jnp.bfloat16), w_ref[...],
                       preferred_element_type=jnp.float32)
        total = part if total is None else total + part
    y = total + b_ref[...]                          # (rows, 8H) f32
    of_ref[...] = y[:, :gate_w]
    ob_ref[...] = y[:, gate_w:]


def _bilstm_kernel(lens_ref, xf_ref, xb_ref, whf_ref, whb_ref,
                   of_ref, ob_ref, hf_sc, cf_sc, hb_sc, cb_sc, *, hidden):
    """Fused bidirectional LSTM recurrence over one T-chunk.

    lens_ref: (B, 1) int32 sequence lengths.
    xf_ref/xb_ref: (tc, B, 4H) f32 precomputed gate pre-activations
        (xb is fed reversed-chunk-order via its BlockSpec).
    whf_ref/whb_ref: (H, 4H) bf16 recurrent weights (gate order i, f, g, o).
    of_ref/ob_ref: (tc, B, H) f32 per-direction hidden outputs.
    h*/c* scratch: (B, H) f32 recurrent state, persists across the T-chunk grid.
    """
    H = hidden
    ti = pl.program_id(0)
    nch = pl.num_programs(0)
    tc = xf_ref.shape[0]

    @pl.when(ti == 0)
    def _init():
        hf_sc[...] = jnp.zeros_like(hf_sc)
        cf_sc[...] = jnp.zeros_like(cf_sc)
        hb_sc[...] = jnp.zeros_like(hb_sc)
        cb_sc[...] = jnp.zeros_like(cb_sc)

    lens = lens_ref[...]                            # (B, 1) int32
    t0_f = ti * tc                                  # global start of fwd chunk
    t0_b = (nch - 1 - ti) * tc                      # global start of bwd chunk

    def _step(x_gates, h_sc, c_sc, w_ref, t_glob):
        gates = x_gates + jnp.dot(h_sc[...].astype(jnp.bfloat16), w_ref[...],
                                  preferred_element_type=jnp.float32)  # (B, 4H)
        i_g = jax.nn.sigmoid(gates[:, 0 * H:1 * H])
        f_g = jax.nn.sigmoid(gates[:, 1 * H:2 * H])
        g_g = jnp.tanh(gates[:, 2 * H:3 * H])
        o_g = jax.nn.sigmoid(gates[:, 3 * H:4 * H])
        c_new = f_g * c_sc[...] + i_g * g_g
        h_new = o_g * jnp.tanh(c_new)
        valid = t_glob < lens                       # packed-sequence validity
        h_sc[...] = jnp.where(valid, h_new, h_sc[...])
        c_sc[...] = jnp.where(valid, c_new, c_sc[...])
        return jnp.where(valid, h_new, 0.0)

    @pl.loop(0, tc)
    def _time_step(s):
        # forward direction walks its chunk left -> right
        of_ref[s] = _step(xf_ref[s], hf_sc, cf_sc, whf_ref,
                          t0_f + s).astype(of_ref.dtype)
        # backward direction walks its (reverse-ordered) chunk right -> left
        sl = tc - 1 - s
        ob_ref[sl] = _step(xb_ref[sl], hb_sc, cb_sc, whb_ref,
                           t0_b + sl).astype(ob_ref.dtype)


def _classifier_kernel(hf_ref, hb_ref, w1f_ref, w1b_ref, b1_ref,
                       w2_ref, b2_ref, out_ref):
    """Linear(2H->H) [K-split over fwd/bwd] -> ReLU -> Linear(H->C_pad)."""
    z = (jnp.dot(hf_ref[...].astype(jnp.bfloat16), w1f_ref[...],
                 preferred_element_type=jnp.float32)
         + jnp.dot(hb_ref[...].astype(jnp.bfloat16), w1b_ref[...],
                   preferred_element_type=jnp.float32)
         + b1_ref[...])
    z = jnp.maximum(z, 0.0)
    # TODO(synk): nn.Dropout(p=0.5) layers are identity in eval mode; not applied.
    out_ref[...] = (jnp.dot(z.astype(jnp.bfloat16), w2_ref[...],
                            preferred_element_type=jnp.float32)
                    + b2_ref[...]).astype(out_ref.dtype)


# -----------------------------------------------------------------------------
# pallas_call wrappers
# -----------------------------------------------------------------------------
def _run_projection(x_list, w_list, bias):
    """x_list: flat (rows, D_i) activations; w_list: matching (D_i, 8H) bf16."""
    rows = x_list[0].shape[0]
    gate2 = w_list[0].shape[1]                      # 8H
    gate_w = gate2 // 2                             # 4H
    rt = _pick_tile(rows)
    grid = (rows // rt,)

    in_specs = []
    for x in x_list:
        in_specs.append(pl.BlockSpec((rt, x.shape[1]), lambda i: (i, 0)))
    for w in w_list:
        in_specs.append(pl.BlockSpec(w.shape, lambda i: (0, 0)))
    in_specs.append(pl.BlockSpec(bias.shape, lambda i: (0, 0)))
    out_specs = (pl.BlockSpec((rt, gate_w), lambda i: (i, 0)),
                 pl.BlockSpec((rt, gate_w), lambda i: (i, 0)))
    out_shape = (jax.ShapeDtypeStruct((rows, gate_w), jnp.float32),
                 jax.ShapeDtypeStruct((rows, gate_w), jnp.float32))

    kern = functools.partial(_proj_kernel, n_in=len(x_list), gate_w=gate_w)
    return pl.pallas_call(
        kern, grid=grid, in_specs=in_specs, out_specs=out_specs,
        out_shape=out_shape,
        compiler_params=pltpu.CompilerParams(
            dimension_semantics=("parallel",), vmem_limit_bytes=_VMEM_LIMIT),
    )(*x_list, *w_list, bias)


def _run_bilstm(xp_f, xp_b, lens, w_hh_f, w_hh_b, hidden):
    """xp_f/xp_b: (T, B, 4H) f32 gate pre-activations; returns h_fwd, h_bwd."""
    T, B, G = xp_f.shape
    tc = _pick_tile(T, (256, 128, 64, 32, 16, 8))
    nch = T // tc

    in_specs = [
        pl.BlockSpec((B, 1), lambda ti: (0, 0)),                     # lengths
        pl.BlockSpec((tc, B, G), lambda ti: (ti, 0, 0)),             # fwd chunks
        pl.BlockSpec((tc, B, G), lambda ti: (nch - 1 - ti, 0, 0)),   # bwd chunks
        pl.BlockSpec(w_hh_f.shape, lambda ti: (0, 0)),
        pl.BlockSpec(w_hh_b.shape, lambda ti: (0, 0)),
    ]
    out_specs = (
        pl.BlockSpec((tc, B, hidden), lambda ti: (ti, 0, 0)),
        pl.BlockSpec((tc, B, hidden), lambda ti: (nch - 1 - ti, 0, 0)),
    )
    out_shape = (jax.ShapeDtypeStruct((T, B, hidden), jnp.float32),
                 jax.ShapeDtypeStruct((T, B, hidden), jnp.float32))
    scratch = [pltpu.VMEM((B, hidden), jnp.float32) for _ in range(4)]

    return pl.pallas_call(
        functools.partial(_bilstm_kernel, hidden=hidden),
        grid=(nch,), in_specs=in_specs, out_specs=out_specs,
        out_shape=out_shape, scratch_shapes=scratch,
        compiler_params=pltpu.CompilerParams(
            dimension_semantics=("arbitrary",), vmem_limit_bytes=_VMEM_LIMIT),
    )(lens, xp_f, xp_b, w_hh_f, w_hh_b)


def _run_classifier(h_f, h_b, w1_f, w1_b, b1, w2, b2):
    rows, H = h_f.shape
    c_pad = w2.shape[1]
    rt = _pick_tile(rows)
    grid = (rows // rt,)
    in_specs = [
        pl.BlockSpec((rt, H), lambda i: (i, 0)),
        pl.BlockSpec((rt, H), lambda i: (i, 0)),
        pl.BlockSpec(w1_f.shape, lambda i: (0, 0)),
        pl.BlockSpec(w1_b.shape, lambda i: (0, 0)),
        pl.BlockSpec(b1.shape, lambda i: (0, 0)),
        pl.BlockSpec(w2.shape, lambda i: (0, 0)),
        pl.BlockSpec(b2.shape, lambda i: (0, 0)),
    ]
    out_specs = pl.BlockSpec((rt, c_pad), lambda i: (i, 0))
    return pl.pallas_call(
        _classifier_kernel, grid=grid, in_specs=in_specs, out_specs=out_specs,
        out_shape=jax.ShapeDtypeStruct((rows, c_pad), jnp.float32),
        compiler_params=pltpu.CompilerParams(
            dimension_semantics=("parallel",), vmem_limit_bytes=_VMEM_LIMIT),
    )(h_f, h_b, w1_f, w1_b, b1, w2, b2)


# -----------------------------------------------------------------------------
# Model: parameter init + forward
# -----------------------------------------------------------------------------
def init_params(key, input_dim, hidden_dim, num_layers, num_classes):
    """Weights packed for the fused kernels (PyTorch gate order i, f, g, o)."""
    H = hidden_dim
    params = {}
    k = 1.0 / float(H) ** 0.5
    keys = list(jax.random.split(key, num_layers * 8 + 4))
    ki = 0

    def unif(shape, bound):
        nonlocal ki
        r = jax.random.uniform(keys[ki], shape, minval=-bound, maxval=bound,
                               dtype=jnp.float32)
        ki += 1
        return r

    for layer in range(num_layers):
        d_in = input_dim if layer == 0 else 2 * H
        w_ih_f = unif((d_in, 4 * H), k)
        w_ih_b = unif((d_in, 4 * H), k)
        w_hh_f = unif((H, 4 * H), k)
        w_hh_b = unif((H, 4 * H), k)
        b_f = unif((1, 4 * H), k) + unif((1, 4 * H), k)   # b_ih + b_hh
        b_b = unif((1, 4 * H), k) + unif((1, 4 * H), k)
        w_ih = jnp.concatenate([w_ih_f, w_ih_b], axis=1)  # (d_in, 8H): [fwd|bwd]
        if layer == 0:
            w_list = [w_ih.astype(jnp.bfloat16)]
        else:
            # next-layer input is [h_fwd | h_bwd]: split along K so the concat
            # of the two directions never has to be materialized.
            w_list = [w_ih[:H].astype(jnp.bfloat16),
                      w_ih[H:].astype(jnp.bfloat16)]
        params[f"lstm_l{layer}"] = {
            "w_ih": w_list,
            "b": jnp.concatenate([b_f, b_b], axis=1),      # (1, 8H) f32
            "w_hh_f": w_hh_f.astype(jnp.bfloat16),
            "w_hh_b": w_hh_b.astype(jnp.bfloat16),
        }

    k1 = 1.0 / float(2 * H) ** 0.5
    w1 = unif((2 * H, H), k1)
    b1 = unif((1, H), k1)
    k2 = 1.0 / float(H) ** 0.5
    c_pad = ((num_classes + 127) // 128) * 128             # lane-dense output
    w2 = unif((H, num_classes), k2)
    b2 = unif((1, num_classes), k2)
    params["cls_w1_f"] = w1[:H].astype(jnp.bfloat16)
    params["cls_w1_b"] = w1[H:].astype(jnp.bfloat16)
    params["cls_b1"] = b1
    params["cls_w2"] = (jnp.zeros((H, c_pad), jnp.float32)
                        .at[:, :num_classes].set(w2)).astype(jnp.bfloat16)
    params["cls_b2"] = jnp.zeros((1, c_pad), jnp.float32).at[:, :num_classes].set(b2)
    return params


def importance_predictor_forward(x, lengths, params, *, hidden_dim, num_layers,
                                 num_classes):
    """x: (B, T, input_dim), lengths: (B,). Returns (B, T, num_classes) f32."""
    B, T, _ = x.shape
    H = hidden_dim
    # Single batch_first -> time-major copy, fused with the bf16 cast.
    x_flat = jnp.transpose(x, (1, 0, 2)).reshape(T * B, -1).astype(jnp.bfloat16)
    lens = lengths.reshape(B, 1).astype(jnp.int32)

    feats = [x_flat]                                       # flat (T*B, D) rows
    for layer in range(num_layers):
        p = params[f"lstm_l{layer}"]
        xp_f, xp_b = _run_projection(feats, p["w_ih"], p["b"])     # (T*B, 4H)
        h_f, h_b = _run_bilstm(xp_f.reshape(T, B, 4 * H),
                               xp_b.reshape(T, B, 4 * H),
                               lens, p["w_hh_f"], p["w_hh_b"], H)  # (T, B, H)
        feats = [h_f.reshape(T * B, H), h_b.reshape(T * B, H)]
        # TODO(synk): inter-layer LSTM dropout (p=0.5) is identity in eval mode.

    logits_flat = _run_classifier(feats[0], feats[1],
                                  params["cls_w1_f"], params["cls_w1_b"],
                                  params["cls_b1"], params["cls_w2"],
                                  params["cls_b2"])                # (T*B, c_pad)
    logits = logits_flat[:, :num_classes].reshape(T, B, num_classes)
    return jnp.transpose(logits, (1, 0, 2))                        # (B, T, C)


# -----------------------------------------------------------------------------
if __name__ == "__main__":
    B, T = 2, 8
    INPUT_DIM, HIDDEN_DIM, NUM_LAYERS, NUM_CLASSES = 64, 32, 2, 4

    key = jax.random.PRNGKey(0)
    kx, kp = jax.random.split(key)
    x = jax.random.normal(kx, (B, T, INPUT_DIM), dtype=jnp.float32)
    # max(lengths) == T so pad_packed_sequence output length matches T.
    lengths = jnp.array([T, 5], dtype=jnp.int32)

    params = init_params(kp, INPUT_DIM, HIDDEN_DIM, NUM_LAYERS, NUM_CLASSES)
    fwd = jax.jit(functools.partial(importance_predictor_forward,
                                    hidden_dim=HIDDEN_DIM,
                                    num_layers=NUM_LAYERS,
                                    num_classes=NUM_CLASSES))
    logits = fwd(x, lengths, params)
    jax.block_until_ready(logits)
    assert logits.shape == (B, T, NUM_CLASSES)
    assert logits.dtype == jnp.float32
    assert bool(jnp.all(jnp.isfinite(logits)))
    print("KERNEL_OK")
</pallas_src>

<mosaic_0001>
module attributes {stable_mosaic.version = 11 : i64} {
  func.func @_proj_kernel(%arg0: i32, %arg1: memref<16x64xbf16, #tpu.memory_space<vmem>>, %arg2: memref<64x256xbf16, #tpu.memory_space<vmem>>, %arg3: memref<1x256xf32, #tpu.memory_space<vmem>>, %arg4: memref<16x128xf32, #tpu.memory_space<vmem>>, %arg5: memref<16x128xf32, #tpu.memory_space<vmem>>) attributes {dimension_semantics = [#tpu.dimension_semantics<parallel>], iteration_bounds = array<i64: 1>, scalar_prefetch = 0 : i64, scratch_operands = 0 : i64, tpu.core_type = #tpu.core_type<tc>, window_params = [{transform_indices = @transform_0, window_bounds = array<i64: 16, 64>}, {pipeline_mode = #tpu.pipeline_mode<synchronous>, transform_indices = @transform_1, window_bounds = array<i64: 64, 256>}, {pipeline_mode = #tpu.pipeline_mode<synchronous>, transform_indices = @transform_2, window_bounds = array<i64: 1, 256>}, {transform_indices = @transform_3, window_bounds = array<i64: 16, 128>}, {transform_indices = @transform_4, window_bounds = array<i64: 16, 128>}]} {
    %c0 = arith.constant 0 : index
    %c0_0 = arith.constant 0 : index
    %0 = vector.load %arg1[%c0, %c0_0] : memref<16x64xbf16, #tpu.memory_space<vmem>>, vector<16x64xbf16>
    %c0_1 = arith.constant 0 : index
    %c0_2 = arith.constant 0 : index
    %1 = vector.load %arg2[%c0_1, %c0_2] : memref<64x256xbf16, #tpu.memory_space<vmem>>, vector<64x256xbf16>
    %cst = arith.constant dense<0.000000e+00> : vector<16x256xf32>
    %2 = tpu.matmul %0, %1, %cst {dimension_numbers = #tpu.dot_dimension_numbers<[1], [0], [0], [1], [0, 0, 1, 1], [], []>} : vector<16x64xbf16>, vector<64x256xbf16>, vector<16x256xf32> -> vector<16x256xf32>
    %c0_3 = arith.constant 0 : index
    %c0_4 = arith.constant 0 : index
    %3 = vector.load %arg3[%c0_3, %c0_4] : memref<1x256xf32, #tpu.memory_space<vmem>>, vector<1x256xf32>
    %4 = vector.broadcast %3 : vector<1x256xf32> to vector<16x256xf32>
    %5 = arith.addf %2, %4 : vector<16x256xf32>
    %6 = vector.extract_strided_slice %5 {offsets = [0, 0], sizes = [16, 128], strides = [1, 1]} : vector<16x256xf32> to vector<16x128xf32>
    %c0_5 = arith.constant 0 : index
    %c0_6 = arith.constant 0 : index
    %7 = vector.load %arg4[%c0_5, %c0_6] : memref<16x128xf32, #tpu.memory_space<vmem>>, vector<16x128xf32>
    tpu.vector_store %arg4[%c0_5, %c0_6], %6 {strides = array<i32>} : memref<16x128xf32, #tpu.memory_space<vmem>>, vector<16x128xf32>,
    %8 = vector.extract_strided_slice %5 {offsets = [0, 128], sizes = [16, 128], strides = [1, 1]} : vector<16x256xf32> to vector<16x128xf32>
    %c0_7 = arith.constant 0 : index
    %c0_8 = arith.constant 0 : index
    %9 = vector.load %arg5[%c0_7, %c0_8] : memref<16x128xf32, #tpu.memory_space<vmem>>, vector<16x128xf32>
    tpu.vector_store %arg5[%c0_7, %c0_8], %8 {strides = array<i32>} : memref<16x128xf32, #tpu.memory_space<vmem>>, vector<16x128xf32>,
    return
  }
  func.func @transform_0(%arg0: i32) -> (i32, i32) {
    %c0_i32 = arith.constant 0 : i32
    %c0_i32_0 = arith.constant 0 : i32
    return %arg0, %c0_i32 : i32, i32
  }
  func.func @transform_1(%arg0: i32) -> (i32, i32) {
    %c0_i32 = arith.constant 0 : i32
    %c0_i32_0 = arith.constant 0 : i32
    %c0_i32_1 = arith.constant 0 : i32
    return %c0_i32, %c0_i32_0 : i32, i32
  }
  func.func @transform_2(%arg0: i32) -> (i32, i32) {
    %c0_i32 = arith.constant 0 : i32
    %c0_i32_0 = arith.constant 0 : i32
    %c0_i32_1 = arith.constant 0 : i32
    return %c0_i32, %c0_i32_0 : i32, i32
  }
  func.func @transform_3(%arg0: i32) -> (i32, i32) {
    %c0_i32 = arith.constant 0 : i32
    %c0_i32_0 = arith.constant 0 : i32
    return %arg0, %c0_i32 : i32, i32
  }
  func.func @transform_4(%arg0: i32) -> (i32, i32) {
    %c0_i32 = arith.constant 0 : i32
    %c0_i32_0 = arith.constant 0 : i32
    return %arg0, %c0_i32 : i32, i32
  }
}

module attributes {stable_mosaic.version = 11 : i64} {
  func.func @_bilstm_kernel(%arg0: i32, %arg1: memref<2x1xi32, #tpu.memory_space<vmem>>, %arg2: memref<8x2x128xf32, #tpu.memory_space<vmem>>, %arg3: memref<8x2x128xf32, #tpu.memory_space<vmem>>, %arg4: memref<32x128xbf16, #tpu.memory_space<vmem>>, %arg5: memref<32x128xbf16, #tpu.memory_space<vmem>>, %arg6: memref<8x2x32xf32, #tpu.memory_space<vmem>>, %arg7: memref<8x2x32xf32, #tpu.memory_space<vmem>>, %arg8: memref<2x32xf32, #tpu.memory_space<vmem>>, %arg9: memref<2x32xf32, #tpu.memory_space<vmem>>, %arg10: memref<2x32xf32, #tpu.memory_space<vmem>>, %arg11: memref<2x32xf32, #tpu.memory_space<vmem>>) attributes {dimension_semantics = [#tpu.dimension_semantics<arbitrary>], iteration_bounds = array<i64: 1>, scalar_prefetch = 0 : i64, scratch_operands = 4 : i64, tpu.core_type = #tpu.core_type<tc>, window_params = [{pipeline_mode = #tpu.pipeline_mode<synchronous>, transform_indices = @transform_0, window_bounds = array<i64: 2, 1>}, {transform_indices = @transform_1, window_bounds = array<i64: 8, 2, 128>}, {transform_indices = @transform_2, window_bounds = array<i64: 8, 2, 128>}, {pipeline_mode = #tpu.pipeline_mode<synchronous>, transform_indices = @transform_3, window_bounds = array<i64: 32, 128>}, {pipeline_mode = #tpu.pipeline_mode<synchronous>, transform_indices = @transform_4, window_bounds = array<i64: 32, 128>}, {transform_indices = @transform_5, window_bounds = array<i64: 8, 2, 32>}, {transform_indices = @transform_6, window_bounds = array<i64: 8, 2, 32>}]} {
    %c0_i32 = arith.constant 0 : i32
    %0 = arith.cmpi eq, %arg0, %c0_i32 : i32
    %1 = arith.extui %0 : i1 to i32
    %c0_i32_0 = arith.constant 0 : i32
    %2 = arith.cmpi ne, %1, %c0_i32_0 : i32
    scf.if %2 {
      %cst = arith.constant 0.000000e+00 : f32
      %8 = vector.broadcast %cst : f32 to vector<2x32xf32>
      %c0_7 = arith.constant 0 : index
      %c0_8 = arith.constant 0 : index
      %9 = vector.load %arg8[%c0_7, %c0_8] : memref<2x32xf32, #tpu.memory_space<vmem>>, vector<2x32xf32>
      tpu.vector_store %arg8[%c0_7, %c0_8], %8 {strides = array<i32>} : memref<2x32xf32, #tpu.memory_space<vmem>>, vector<2x32xf32>,
      %cst_9 = arith.constant 0.000000e+00 : f32
      %10 = vector.broadcast %cst_9 : f32 to vector<2x32xf32>
      %c0_10 = arith.constant 0 : index
      %c0_11 = arith.constant 0 : index
      %11 = vector.load %arg9[%c0_10, %c0_11] : memref<2x32xf32, #tpu.memory_space<vmem>>, vector<2x32xf32>
      tpu.vector_store %arg9[%c0_10, %c0_11], %10 {strides = array<i32>} : memref<2x32xf32, #tpu.memory_space<vmem>>, vector<2x32xf32>,
      %cst_12 = arith.constant 0.000000e+00 : f32
      %12 = vector.broadcast %cst_12 : f32 to vector<2x32xf32>
      %c0_13 = arith.constant 0 : index
      %c0_14 = arith.constant 0 : index
      %13 = vector.load %arg10[%c0_13, %c0_14] : memref<2x32xf32, #tpu.memory_space<vmem>>, vector<2x32xf32>
      tpu.vector_store %arg10[%c0_13, %c0_14], %12 {strides = array<i32>} : memref<2x32xf32, #tpu.memory_space<vmem>>, vector<2x32xf32>,
      %cst_15 = arith.constant 0.000000e+00 : f32
      %14 = vector.broadcast %cst_15 : f32 to vector<2x32xf32>
      %c0_16 = arith.constant 0 : index
      %c0_17 = arith.constant 0 : index
      %15 = vector.load %arg11[%c0_16, %c0_17] : memref<2x32xf32, #tpu.memory_space<vmem>>, vector<2x32xf32>
      tpu.vector_store %arg11[%c0_16, %c0_17], %14 {strides = array<i32>} : memref<2x32xf32, #tpu.memory_space<vmem>>, vector<2x32xf32>,
    } else {
    }
    %c0 = arith.constant 0 : index
    %c0_1 = arith.constant 0 : index
    %3 = vector.load %arg1[%c0, %c0_1] : memref<2x1xi32, #tpu.memory_space<vmem>>, vector<2x1xi32>
    %c8_i32 = arith.constant 8 : i32
    %4 = arith.muli %arg0, %c8_i32 : i32
    %c0_i32_2 = arith.constant 0 : i32
    %5 = arith.subi %c0_i32_2, %arg0 : i32
    %c8_i32_3 = arith.constant 8 : i32
    %6 = arith.muli %5, %c8_i32_3 : i32
    %c0_i32_4 = arith.constant 0 : i32
    %c8_i32_5 = arith.constant 8 : i32
    %7 = arith.addi %c0_i32_4, %c8_i32_5 : i32
    %c1_i32 = arith.constant 1 : i32
    scf.for %arg12 = %c0_i32_4 to %7 step %c1_i32  : i32 {
      %c1_i32_7 = arith.constant 1 : i32
      %8 = arith.muli %arg12, %c1_i32_7 : i32
      %c0_i32_8 = arith.constant 0 : i32
      %9 = arith.addi %c0_i32_8, %8 : i32
      %10 = arith.index_cast %9 : i32 to index
      %c0_9 = arith.constant 0 : index
      %c0_10 = arith.constant 0 : index
      %11 = vector.load %arg2[%10, %c0_9, %c0_10] : memref<8x2x128xf32, #tpu.memory_space<vmem>>, vector<1x2x128xf32>
      %12 = vector.shape_cast %11 : vector<1x2x128xf32> to vector<2x128xf32>
      %13 = arith.addi %4, %9 : i32
      %c0_11 = arith.constant 0 : index
      %c0_12 = arith.constant 0 : index
      %14 = vector.load %arg8[%c0_11, %c0_12] : memref<2x32xf32, #tpu.memory_space<vmem>>, vector<2x32xf32>
      %15 = arith.truncf %14 : vector<2x32xf32> to vector<2x32xbf16>
      %c0_13 = arith.constant 0 : index
      %c0_14 = arith.constant 0 : index
      %16 = vector.load %arg4[%c0_13, %c0_14] : memref<32x128xbf16, #tpu.memory_space<vmem>>, vector<32x128xbf16>
      %cst = arith.constant dense<0.000000e+00> : vector<2x128xf32>
      %17 = tpu.matmul %15, %16, %cst {dimension_numbers = #tpu.dot_dimension_numbers<[1], [0], [0], [1], [0, 0, 1, 1], [], []>} : vector<2x32xbf16>, vector<32x128xbf16>, vector<2x128xf32> -> vector<2x128xf32>
      %18 = arith.addf %12, %17 : vector<2x128xf32>
      %19 = vector.extract_strided_slice %18 {offsets = [0, 0], sizes = [2, 32], strides = [1, 1]} : vector<2x128xf32> to vector<2x32xf32>
      %20 = arith.negf %19 : vector<2x32xf32>
      %21 = math.exp %20 : vector<2x32xf32>
      %cst_15 = arith.constant 1.000000e+00 : f32
      %22 = vector.broadcast %cst_15 : f32 to vector<2x32xf32>
      %23 = arith.addf %22, %21 : vector<2x32xf32>
      %24 = arith.divf %22, %23 : vector<2x32xf32>
      %25 = vector.extract_strided_slice %18 {offsets = [0, 32], sizes = [2, 32], strides = [1, 1]} : vector<2x128xf32> to vector<2x32xf32>
      %26 = arith.negf %25 : vector<2x32xf32>
      %27 = math.exp %26 : vector<2x32xf32>
      %cst_16 = arith.constant 1.000000e+00 : f32
      %28 = vector.broadcast %cst_16 : f32 to vector<2x32xf32>
      %29 = arith.addf %28, %27 : vector<2x32xf32>
      %30 = arith.divf %28, %29 : vector<2x32xf32>
      %31 = vector.extract_strided_slice %18 {offsets = [0, 64], sizes = [2, 32], strides = [1, 1]} : vector<2x128xf32> to vector<2x32xf32>
      %32 = math.tanh %31 : vector<2x32xf32>
      %33 = vector.extract_strided_slice %18 {offsets = [0, 96], sizes = [2, 32], strides = [1, 1]} : vector<2x128xf32> to vector<2x32xf32>
      %34 = arith.negf %33 : vector<2x32xf32>
      %35 = math.exp %34 : vector<2x32xf32>
      %cst_17 = arith.constant 1.000000e+00 : f32
      %36 = vector.broadcast %cst_17 : f32 to vector<2x32xf32>
      %37 = arith.addf %36, %35 : vector<2x32xf32>
      %38 = arith.divf %36, %37 : vector<2x32xf32>
      %c0_18 = arith.constant 0 : index
      %c0_19 = arith.constant 0 : index
      %39 = vector.load %arg9[%c0_18, %c0_19] : memref<2x32xf32, #tpu.memory_space<vmem>>, vector<2x32xf32>
      %40 = arith.mulf %30, %39 : vector<2x32xf32>
      %41 = arith.mulf %24, %32 : vector<2x32xf32>
      %42 = arith.addf %40, %41 : vector<2x32xf32>
      %43 = math.tanh %42 : vector<2x32xf32>
      %44 = arith.mulf %38, %43 : vector<2x32xf32>
      %45 = vector.broadcast %13 : i32 to vector<2x1xi32>
      %46 = arith.cmpi slt, %45, %3 : vector<2x1xi32>
      %c0_20 = arith.constant 0 : index
      %c0_21 = arith.constant 0 : index
      %47 = vector.load %arg8[%c0_20, %c0_21] : memref<2x32xf32, #tpu.memory_space<vmem>>, vector<2x32xf32>
      %48 = vector.shape_cast %46 : vector<2x1xi1> to vector<2x1xi1>
      %49 = vector.broadcast %48 : vector<2x1xi1> to vector<2x32xi1>
      %50 = arith.select %49, %44, %47 : vector<2x32xi1>, vector<2x32xf32>
      %c0_22 = arith.constant 0 : index
      %c0_23 = arith.constant 0 : index
      %51 = vector.load %arg8[%c0_22, %c0_23] : memref<2x32xf32, #tpu.memory_space<vmem>>, vector<2x32xf32>
      tpu.vector_store %arg8[%c0_22, %c0_23], %50 {strides = array<i32>} : memref<2x32xf32, #tpu.memory_space<vmem>>, vector<2x32xf32>,
      %c0_24 = arith.constant 0 : index
      %c0_25 = arith.constant 0 : index
      %52 = vector.load %arg9[%c0_24, %c0_25] : memref<2x32xf32, #tpu.memory_space<vmem>>, vector<2x32xf32>
      %53 = vector.shape_cast %46 : vector<2x1xi1> to vector<2x1xi1>
      %54 = vector.broadcast %53 : vector<2x1xi1> to vector<2x32xi1>
      %55 = arith.select %54, %42, %52 : vector<2x32xi1>, vector<2x32xf32>
      %c0_26 = arith.constant 0 : index
      %c0_27 = arith.constant 0 : index
      %56 = vector.load %arg9[%c0_26, %c0_27] : memref<2x32xf32, #tpu.memory_space<vmem>>, vector<2x32xf32>
      tpu.vector_store %arg9[%c0_26, %c0_27], %55 {strides = array<i32>} : memref<2x32xf32, #tpu.memory_space<vmem>>, vector<2x32xf32>,
      %cst_28 = arith.constant 0.000000e+00 : f32
      %57 = vector.shape_cast %46 : vector<2x1xi1> to vector<2x1xi1>
      %58 = vector.broadcast %57 : vector<2x1xi1> to vector<2x32xi1>
      %59 = vector.broadcast %cst_28 : f32 to vector<2x32xf32>
      %60 = arith.select %58, %44, %59 : vector<2x32xi1>, vector<2x32xf32>
      %61 = arith.index_cast %9 : i32 to index
      %c0_29 = arith.constant 0 : index
      %c0_30 = arith.constant 0 : index
      %62 = vector.load %arg6[%61, %c0_29, %c0_30] : memref<8x2x32xf32, #tpu.memory_space<vmem>>, vector<1x2x32xf32>
      %63 = vector.shape_cast %62 : vector<1x2x32xf32> to vector<2x32xf32>
      %64 = vector.shape_cast %60 : vector<2x32xf32> to vector<1x2x32xf32>
      tpu.vector_store %arg6[%61, %c0_29, %c0_30], %64 {strides = array<i32>} : memref<8x2x32xf32, #tpu.memory_space<vmem>>, vector<1x2x32xf32>,
      %c7_i32 = arith.constant 7 : i32
      %65 = arith.subi %c7_i32, %9 : i32
      %66 = arith.index_cast %65 : i32 to index
      %c0_31 = arith.constant 0 : index
      %c0_32 = arith.constant 0 : index
      %67 = vector.load %arg3[%66, %c0_31, %c0_32] : memref<8x2x128xf32, #tpu.memory_space<vmem>>, vector<1x2x128xf32>
      %68 = vector.shape_cast %67 : vector<1x2x128xf32> to vector<2x128xf32>
      %69 = arith.addi %6, %65 : i32
      %c0_33 = arith.constant 0 : index
      %c0_34 = arith.constant 0 : index
      %70 = vector.load %arg10[%c0_33, %c0_34] : memref<2x32xf32, #tpu.memory_space<vmem>>, vector<2x32xf32>
      %71 = arith.truncf %70 : vector<2x32xf32> to vector<2x32xbf16>
      %c0_35 = arith.constant 0 : index
      %c0_36 = arith.constant 0 : index
      %72 = vector.load %arg5[%c0_35, %c0_36] : memref<32x128xbf16, #tpu.memory_space<vmem>>, vector<32x128xbf16>
      %cst_37 = arith.constant dense<0.000000e+00> : vector<2x128xf32>
      %73 = tpu.matmul %71, %72, %cst_37 {dimension_numbers = #tpu.dot_dimension_numbers<[1], [0], [0], [1], [0, 0, 1, 1], [], []>} : vector<2x32xbf16>, vector<32x128xbf16>, vector<2x128xf32> -> vector<2x128xf32>
      %74 = arith.addf %68, %73 : vector<2x128xf32>
      %75 = vector.extract_strided_slice %74 {offsets = [0, 0], sizes = [2, 32], strides = [1, 1]} : vector<2x128xf32> to vector<2x32xf32>
      %76 = arith.negf %75 : vector<2x32xf32>
      %77 = math.exp %76 : vector<2x32xf32>
      %cst_38 = arith.constant 1.000000e+00 : f32
      %78 = vector.broadcast %cst_38 : f32 to vector<2x32xf32>
      %79 = arith.addf %78, %77 : vector<2x32xf32>
      %80 = arith.divf %78, %79 : vector<2x32xf32>
      %81 = vector.extract_strided_slice %74 {offsets = [0, 32], sizes = [2, 32], strides = [1, 1]} : vector<2x128xf32> to vector<2x32xf32>
      %82 = arith.negf %81 : vector<2x32xf32>
      %83 = math.exp %82 : vector<2x32xf32>
      %cst_39 = arith.constant 1.000000e+00 : f32
      %84 = vector.broadcast %cst_39 : f32 to vector<2x32xf32>
      %85 = arith.addf %84, %83 : vector<2x32xf32>
      %86 = arith.divf %84, %85 : vector<2x32xf32>
      %87 = vector.extract_strided_slice %74 {offsets = [0, 64], sizes = [2, 32], strides = [1, 1]} : vector<2x128xf32> to vector<2x32xf32>
      %88 = math.tanh %87 : vector<2x32xf32>
      %89 = vector.extract_strided_slice %74 {offsets = [0, 96], sizes = [2, 32], strides = [1, 1]} : vector<2x128xf32> to vector<2x32xf32>
      %90 = arith.negf %89 : vector<2x32xf32>
      %91 = math.exp %90 : vector<2x32xf32>
      %cst_40 = arith.constant 1.000000e+00 : f32
      %92 = vector.broadcast %cst_40 : f32 to vector<2x32xf32>
      %93 = arith.addf %92, %91 : vector<2x32xf32>
      %94 = arith.divf %92, %93 : vector<2x32xf32>
      %c0_41 = arith.constant 0 : index
      %c0_42 = arith.constant 0 : index
      %95 = vector.load %arg11[%c0_41, %c0_42] : memref<2x32xf32, #tpu.memory_space<vmem>>, vector<2x32xf32>
      %96 = arith.mulf %86, %95 : vector<2x32xf32>
      %97 = arith.mulf %80, %88 : vector<2x32xf32>
      %98 = arith.addf %96, %97 : vector<2x32xf32>
      %99 = math.tanh %98 : vector<2x32xf32>
      %100 = arith.mulf %94, %99 : vector<2x32xf32>
      %101 = vector.broadcast %69 : i32 to vector<2x1xi32>
      %102 = arith.cmpi slt, %101, %3 : vector<2x1xi32>
      %c0_43 = arith.constant 0 : index
      %c0_44 = arith.constant 0 : index
      %103 = vector.load %arg10[%c0_43, %c0_44] : memref<2x32xf32, #tpu.memory_space<vmem>>, vector<2x32xf32>
      %104 = vector.shape_cast %102 : vector<2x1xi1> to vector<2x1xi1>
      %105 = vector.broadcast %104 : vector<2x1xi1> to vector<2x32xi1>
      %106 = arith.select %105, %100, %103 : vector<2x32xi1>, vector<2x32xf32>
      %c0_45 = arith.constant 0 : index
      %c0_46 = arith.constant 0 : index
      %107 = vector.load %arg10[%c0_45, %c0_46] : memref<2x32xf32, #tpu.memory_space<vmem>>, vector<2x32xf32>
      tpu.vector_store %arg10[%c0_45, %c0_46], %106 {strides = array<i32>} : memref<2x32xf32, #tpu.memory_space<vmem>>, vector<2x32xf32>,
      %c0_47 = arith.constant 0 : index
      %c0_48 = arith.constant 0 : index
      %108 = vector.load %arg11[%c0_47, %c0_48] : memref<2x32xf32, #tpu.memory_space<vmem>>, vector<2x32xf32>
      %109 = vector.shape_cast %102 : vector<2x1xi1> to vector<2x1xi1>
      %110 = vector.broadcast %109 : vector<2x1xi1> to vector<2x32xi1>
      %111 = arith.select %110, %98, %108 : vector<2x32xi1>, vector<2x32xf32>
      %c0_49 = arith.constant 0 : index
      %c0_50 = arith.constant 0 : index
      %112 = vector.load %arg11[%c0_49, %c0_50] : memref<2x32xf32, #tpu.memory_space<vmem>>, vector<2x32xf32>
      tpu.vector_store %arg11[%c0_49, %c0_50], %111 {strides = array<i32>} : memref<2x32xf32, #tpu.memory_space<vmem>>, vector<2x32xf32>,
      %cst_51 = arith.constant 0.000000e+00 : f32
      %113 = vector.shape_cast %102 : vector<2x1xi1> to vector<2x1xi1>
      %114 = vector.broadcast %113 : vector<2x1xi1> to vector<2x32xi1>
      %115 = vector.broadcast %cst_51 : f32 to vector<2x32xf32>
      %116 = arith.select %114, %100, %115 : vector<2x32xi1>, vector<2x32xf32>
      %117 = arith.index_cast %65 : i32 to index
      %c0_52 = arith.constant 0 : index
      %c0_53 = arith.constant 0 : index
      %118 = vector.load %arg7[%117, %c0_52, %c0_53] : memref<8x2x32xf32, #tpu.memory_space<vmem>>, vector<1x2x32xf32>
      %119 = vector.shape_cast %118 : vector<1x2x32xf32> to vector<2x32xf32>
      %120 = vector.shape_cast %116 : vector<2x32xf32> to vector<1x2x32xf32>
      tpu.vector_store %arg7[%117, %c0_52, %c0_53], %120 {strides = array<i32>} : memref<8x2x32xf32, #tpu.memory_space<vmem>>, vector<1x2x32xf32>,
    }
    %c8_i32_6 = arith.constant 8 : i32
    return
  }
  func.func @transform_0(%arg0: i32) -> (i32, i32) {
    %c0_i32 = arith.constant 0 : i32
    %c0_i32_0 = arith.constant 0 : i32
    %c0_i32_1 = arith.constant 0 : i32
    return %c0_i32, %c0_i32_0 : i32, i32
  }
  func.func @transform_1(%arg0: i32) -> (i32, i32, i32) {
    %c0_i32 = arith.constant 0 : i32
    %c0_i32_0 = arith.constant 0 : i32
    %c0_i32_1 = arith.constant 0 : i32
    return %arg0, %c0_i32, %c0_i32_0 : i32, i32, i32
  }
  func.func @transform_2(%arg0: i32) -> (i32, i32, i32) {
    %c0_i32 = arith.constant 0 : i32
    %0 = arith.subi %c0_i32, %arg0 : i32
    %c0_i32_0 = arith.constant 0 : i32
    %c0_i32_1 = arith.constant 0 : i32
    %c0_i32_2 = arith.constant 0 : i32
    return %0, %c0_i32_0, %c0_i32_1 : i32, i32, i32
  }
  func.func @transform_3(%arg0: i32) -> (i32, i32) {
    %c0_i32 = arith.constant 0 : i32
    %c0_i32_0 = arith.constant 0 : i32
    %c0_i32_1 = arith.constant 0 : i32
    return %c0_i32, %c0_i32_0 : i32, i32
  }
  func.func @transform_4(%arg0: i32) -> (i32, i32) {
    %c0_i32 = arith.constant 0 : i32
    %c0_i32_0 = arith.constant 0 : i32
    %c0_i32_1 = arith.constant 0 : i32
    return %c0_i32, %c0_i32_0 : i32, i32
  }
  func.func @transform_5(%arg0: i32) -> (i32, i32, i32) {
    %c0_i32 = arith.constant 0 : i32
    %c0_i32_0 = arith.constant 0 : i32
    %c0_i32_1 = arith.constant 0 : i32
    return %arg0, %c0_i32, %c0_i32_0 : i32, i32, i32
  }
  func.func @transform_6(%arg0: i32) -> (i32, i32, i32) {
    %c0_i32 = arith.constant 0 : i32
    %0 = arith.subi %c0_i32, %arg0 : i32
    %c0_i32_0 = arith.constant 0 : i32
    %c0_i32_1 = arith.constant 0 : i32
    %c0_i32_2 = arith.constant 0 : i32
    return %0, %c0_i32_0, %c0_i32_1 : i32, i32, i32
  }
}

module attributes {stable_mosaic.version = 11 : i64} {
  func.func @_proj_kernel(%arg0: i32, %arg1: memref<16x32xf32, #tpu.memory_space<vmem>>, %arg2: memref<16x32xf32, #tpu.memory_space<vmem>>, %arg3: memref<32x256xbf16, #tpu.memory_space<vmem>>, %arg4: memref<32x256xbf16, #tpu.memory_space<vmem>>, %arg5: memref<1x256xf32, #tpu.memory_space<vmem>>, %arg6: memref<16x128xf32, #tpu.memory_space<vmem>>, %arg7: memref<16x128xf32, #tpu.memory_space<vmem>>) attributes {dimension_semantics = [#tpu.dimension_semantics<parallel>], iteration_bounds = array<i64: 1>, scalar_prefetch = 0 : i64, scratch_operands = 0 : i64, tpu.core_type = #tpu.core_type<tc>, window_params = [{transform_indices = @transform_0, window_bounds = array<i64: 16, 32>}, {transform_indices = @transform_1, window_bounds = array<i64: 16, 32>}, {pipeline_mode = #tpu.pipeline_mode<synchronous>, transform_indices = @transform_2, window_bounds = array<i64: 32, 256>}, {pipeline_mode = #tpu.pipeline_mode<synchronous>, transform_indices = @transform_3, window_bounds = array<i64: 32, 256>}, {pipeline_mode = #tpu.pipeline_mode<synchronous>, transform_indices = @transform_4, window_bounds = array<i64: 1, 256>}, {transform_indices = @transform_5, window_bounds = array<i64: 16, 128>}, {transform_indices = @transform_6, window_bounds = array<i64: 16, 128>}]} {
    %c0 = arith.constant 0 : index
    %c0_0 = arith.constant 0 : index
    %0 = vector.load %arg1[%c0, %c0_0] : memref<16x32xf32, #tpu.memory_space<vmem>>, vector<16x32xf32>
    %1 = arith.truncf %0 : vector<16x32xf32> to vector<16x32xbf16>
    %c0_1 = arith.constant 0 : index
    %c0_2 = arith.constant 0 : index
    %2 = vector.load %arg3[%c0_1, %c0_2] : memref<32x256xbf16, #tpu.memory_space<vmem>>, vector<32x256xbf16>
    %cst = arith.constant dense<0.000000e+00> : vector<16x256xf32>
    %3 = tpu.matmul %1, %2, %cst {dimension_numbers = #tpu.dot_dimension_numbers<[1], [0], [0], [1], [0, 0, 1, 1], [], []>} : vector<16x32xbf16>, vector<32x256xbf16>, vector<16x256xf32> -> vector<16x256xf32>
    %c0_3 = arith.constant 0 : index
    %c0_4 = arith.constant 0 : index
    %4 = vector.load %arg2[%c0_3, %c0_4] : memref<16x32xf32, #tpu.memory_space<vmem>>, vector<16x32xf32>
    %5 = arith.truncf %4 : vector<16x32xf32> to vector<16x32xbf16>
    %c0_5 = arith.constant 0 : index
    %c0_6 = arith.constant 0 : index
    %6 = vector.load %arg4[%c0_5, %c0_6] : memref<32x256xbf16, #tpu.memory_space<vmem>>, vector<32x256xbf16>
    %cst_7 = arith.constant dense<0.000000e+00> : vector<16x256xf32>
    %7 = tpu.matmul %5, %6, %cst_7 {dimension_numbers = #tpu.dot_dimension_numbers<[1], [0], [0], [1], [0, 0, 1, 1], [], []>} : vector<16x32xbf16>, vector<32x256xbf16>, vector<16x256xf32> -> vector<16x256xf32>
    %8 = arith.addf %3, %7 : vector<16x256xf32>
    %c0_8 = arith.constant 0 : index
    %c0_9 = arith.constant 0 : index
    %9 = vector.load %arg5[%c0_8, %c0_9] : memref<1x256xf32, #tpu.memory_space<vmem>>, vector<1x256xf32>
    %10 = vector.broadcast %9 : vector<1x256xf32> to vector<16x256xf32>
    %11 = arith.addf %8, %10 : vector<16x256xf32>
    %12 = vector.extract_strided_slice %11 {offsets = [0, 0], sizes = [16, 128], strides = [1, 1]} : vector<16x256xf32> to vector<16x128xf32>
    %c0_10 = arith.constant 0 : index
    %c0_11 = arith.constant 0 : index
    %13 = vector.load %arg6[%c0_10, %c0_11] : memref<16x128xf32, #tpu.memory_space<vmem>>, vector<16x128xf32>
    tpu.vector_store %arg6[%c0_10, %c0_11], %12 {strides = array<i32>} : memref<16x128xf32, #tpu.memory_space<vmem>>, vector<16x128xf32>,
    %14 = vector.extract_strided_slice %11 {offsets = [0, 128], sizes = [16, 128], strides = [1, 1]} : vector<16x256xf32> to vector<16x128xf32>
    %c0_12 = arith.constant 0 : index
    %c0_13 = arith.constant 0 : index
    %15 = vector.load %arg7[%c0_12, %c0_13] : memref<16x128xf32, #tpu.memory_space<vmem>>, vector<16x128xf32>
    tpu.vector_store %arg7[%c0_12, %c0_13], %14 {strides = array<i32>} : memref<16x128xf32, #tpu.memory_space<vmem>>, vector<16x128xf32>,
    return
  }
  func.func @transform_0(%arg0: i32) -> (i32, i32) {
    %c0_i32 = arith.constant 0 : i32
    %c0_i32_0 = arith.constant 0 : i32
    return %arg0, %c0_i32 : i32, i32
  }
  func.func @transform_1(%arg0: i32) -> (i32, i32) {
    %c0_i32 = arith.constant 0 : i32
    %c0_i32_0 = arith.constant 0 : i32
    return %arg0, %c0_i32 : i32, i32
  }
  func.func @transform_2(%arg0: i32) -> (i32, i32) {
    %c0_i32 = arith.constant 0 : i32
    %c0_i32_0 = arith.constant 0 : i32
    %c0_i32_1 = arith.constant 0 : i32
    return %c0_i32, %c0_i32_0 : i32, i32
  }
  func.func @transform_3(%arg0: i32) -> (i32, i32) {
    %c0_i32 = arith.constant 0 : i32
    %c0_i32_0 = arith.constant 0 : i32
    %c0_i32_1 = arith.constant 0 : i32
    return %c0_i32, %c0_i32_0 : i32, i32
  }
  func.func @transform_4(%arg0: i32) -> (i32, i32) {
    %c0_i32 = arith.constant 0 : i32
    %c0_i32_0 = arith.constant 0 : i32
    %c0_i32_1 = arith.constant 0 : i32
    return %c0_i32, %c0_i32_0 : i32, i32
  }
  func.func @transform_5(%arg0: i32) -> (i32, i32) {
    %c0_i32 = arith.constant 0 : i32
    %c0_i32_0 = arith.constant 0 : i32
    return %arg0, %c0_i32 : i32, i32
  }
  func.func @transform_6(%arg0: i32) -> (i32, i32) {
    %c0_i32 = arith.constant 0 : i32
    %c0_i32_0 = arith.constant 0 : i32
    return %arg0, %c0_i32 : i32, i32
  }
}

module attributes {stable_mosaic.version = 11 : i64} {
  func.func @_bilstm_kernel(%arg0: i32, %arg1: memref<2x1xi32, #tpu.memory_space<vmem>>, %arg2: memref<8x2x128xf32, #tpu.memory_space<vmem>>, %arg3: memref<8x2x128xf32, #tpu.memory_space<vmem>>, %arg4: memref<32x128xbf16, #tpu.memory_space<vmem>>, %arg5: memref<32x128xbf16, #tpu.memory_space<vmem>>, %arg6: memref<8x2x32xf32, #tpu.memory_space<vmem>>, %arg7: memref<8x2x32xf32, #tpu.memory_space<vmem>>, %arg8: memref<2x32xf32, #tpu.memory_space<vmem>>, %arg9: memref<2x32xf32, #tpu.memory_space<vmem>>, %arg10: memref<2x32xf32, #tpu.memory_space<vmem>>, %arg11: memref<2x32xf32, #tpu.memory_space<vmem>>) attributes {dimension_semantics = [#tpu.dimension_semantics<arbitrary>], iteration_bounds = array<i64: 1>, scalar_prefetch = 0 : i64, scratch_operands = 4 : i64, tpu.core_type = #tpu.core_type<tc>, window_params = [{pipeline_mode = #tpu.pipeline_mode<synchronous>, transform_indices = @transform_0, window_bounds = array<i64: 2, 1>}, {transform_indices = @transform_1, window_bounds = array<i64: 8, 2, 128>}, {transform_indices = @transform_2, window_bounds = array<i64: 8, 2, 128>}, {pipeline_mode = #tpu.pipeline_mode<synchronous>, transform_indices = @transform_3, window_bounds = array<i64: 32, 128>}, {pipeline_mode = #tpu.pipeline_mode<synchronous>, transform_indices = @transform_4, window_bounds = array<i64: 32, 128>}, {transform_indices = @transform_5, window_bounds = array<i64: 8, 2, 32>}, {transform_indices = @transform_6, window_bounds = array<i64: 8, 2, 32>}]} {
    %c0_i32 = arith.constant 0 : i32
    %0 = arith.cmpi eq, %arg0, %c0_i32 : i32
    %1 = arith.extui %0 : i1 to i32
    %c0_i32_0 = arith.constant 0 : i32
    %2 = arith.cmpi ne, %1, %c0_i32_0 : i32
    scf.if %2 {
      %cst = arith.constant 0.000000e+00 : f32
      %8 = vector.broadcast %cst : f32 to vector<2x32xf32>
      %c0_7 = arith.constant 0 : index
      %c0_8 = arith.constant 0 : index
      %9 = vector.load %arg8[%c0_7, %c0_8] : memref<2x32xf32, #tpu.memory_space<vmem>>, vector<2x32xf32>
      tpu.vector_store %arg8[%c0_7, %c0_8], %8 {strides = array<i32>} : memref<2x32xf32, #tpu.memory_space<vmem>>, vector<2x32xf32>,
      %cst_9 = arith.constant 0.000000e+00 : f32
      %10 = vector.broadcast %cst_9 : f32 to vector<2x32xf32>
      %c0_10 = arith.constant 0 : index
      %c0_11 = arith.constant 0 : index
      %11 = vector.load %arg9[%c0_10, %c0_11] : memref<2x32xf32, #tpu.memory_space<vmem>>, vector<2x32xf32>
      tpu.vector_store %arg9[%c0_10, %c0_11], %10 {strides = array<i32>} : memref<2x32xf32, #tpu.memory_space<vmem>>, vector<2x32xf32>,
      %cst_12 = arith.constant 0.000000e+00 : f32
      %12 = vector.broadcast %cst_12 : f32 to vector<2x32xf32>
      %c0_13 = arith.constant 0 : index
      %c0_14 = arith.constant 0 : index
      %13 = vector.load %arg10[%c0_13, %c0_14] : memref<2x32xf32, #tpu.memory_space<vmem>>, vector<2x32xf32>
      tpu.vector_store %arg10[%c0_13, %c0_14], %12 {strides = array<i32>} : memref<2x32xf32, #tpu.memory_space<vmem>>, vector<2x32xf32>,
      %cst_15 = arith.constant 0.000000e+00 : f32
      %14 = vector.broadcast %cst_15 : f32 to vector<2x32xf32>
      %c0_16 = arith.constant 0 : index
      %c0_17 = arith.constant 0 : index
      %15 = vector.load %arg11[%c0_16, %c0_17] : memref<2x32xf32, #tpu.memory_space<vmem>>, vector<2x32xf32>
      tpu.vector_store %arg11[%c0_16, %c0_17], %14 {strides = array<i32>} : memref<2x32xf32, #tpu.memory_space<vmem>>, vector<2x32xf32>,
    } else {
    }
    %c0 = arith.constant 0 : index
    %c0_1 = arith.constant 0 : index
    %3 = vector.load %arg1[%c0, %c0_1] : memref<2x1xi32, #tpu.memory_space<vmem>>, vector<2x1xi32>
    %c8_i32 = arith.constant 8 : i32
    %4 = arith.muli %arg0, %c8_i32 : i32
    %c0_i32_2 = arith.constant 0 : i32
    %5 = arith.subi %c0_i32_2, %arg0 : i32
    %c8_i32_3 = arith.constant 8 : i32
    %6 = arith.muli %5, %c8_i32_3 : i32
    %c0_i32_4 = arith.constant 0 : i32
    %c8_i32_5 = arith.constant 8 : i32
    %7 = arith.addi %c0_i32_4, %c8_i32_5 : i32
    %c1_i32 = arith.constant 1 : i32
    scf.for %arg12 = %c0_i32_4 to %7 step %c1_i32  : i32 {
      %c1_i32_7 = arith.constant 1 : i32
      %8 = arith.muli %arg12, %c1_i32_7 : i32
      %c0_i32_8 = arith.constant 0 : i32
      %9 = arith.addi %c0_i32_8, %8 : i32
      %10 = arith.index_cast %9 : i32 to index
      %c0_9 = arith.constant 0 : index
      %c0_10 = arith.constant 0 : index
      %11 = vector.load %arg2[%10, %c0_9, %c0_10] : memref<8x2x128xf32, #tpu.memory_space<vmem>>, vector<1x2x128xf32>
      %12 = vector.shape_cast %11 : vector<1x2x128xf32> to vector<2x128xf32>
      %13 = arith.addi %4, %9 : i32
      %c0_11 = arith.constant 0 : index
      %c0_12 = arith.constant 0 : index
      %14 = vector.load %arg8[%c0_11, %c0_12] : memref<2x32xf32, #tpu.memory_space<vmem>>, vector<2x32xf32>
      %15 = arith.truncf %14 : vector<2x32xf32> to vector<2x32xbf16>
      %c0_13 = arith.constant 0 : index
      %c0_14 = arith.constant 0 : index
      %16 = vector.load %arg4[%c0_13, %c0_14] : memref<32x128xbf16, #tpu.memory_space<vmem>>, vector<32x128xbf16>
      %cst = arith.constant dense<0.000000e+00> : vector<2x128xf32>
      %17 = tpu.matmul %15, %16, %cst {dimension_numbers = #tpu.dot_dimension_numbers<[1], [0], [0], [1], [0, 0, 1, 1], [], []>} : vector<2x32xbf16>, vector<32x128xbf16>, vector<2x128xf32> -> vector<2x128xf32>
      %18 = arith.addf %12, %17 : vector<2x128xf32>
      %19 = vector.extract_strided_slice %18 {offsets = [0, 0], sizes = [2, 32], strides = [1, 1]} : vector<2x128xf32> to vector<2x32xf32>
      %20 = arith.negf %19 : vector<2x32xf32>
      %21 = math.exp %20 : vector<2x32xf32>
      %cst_15 = arith.constant 1.000000e+00 : f32
      %22 = vector.broadcast %cst_15 : f32 to vector<2x32xf32>
      %23 = arith.addf %22, %21 : vector<2x32xf32>
      %24 = arith.divf %22, %23 : vector<2x32xf32>
      %25 = vector.extract_strided_slice %18 {offsets = [0, 32], sizes = [2, 32], strides = [1, 1]} : vector<2x128xf32> to vector<2x32xf32>
      %26 = arith.negf %25 : vector<2x32xf32>
      %27 = math.exp %26 : vector<2x32xf32>
      %cst_16 = arith.constant 1.000000e+00 : f32
      %28 = vector.broadcast %cst_16 : f32 to vector<2x32xf32>
      %29 = arith.addf %28, %27 : vector<2x32xf32>
      %30 = arith.divf %28, %29 : vector<2x32xf32>
      %31 = vector.extract_strided_slice %18 {offsets = [0, 64], sizes = [2, 32], strides = [1, 1]} : vector<2x128xf32> to vector<2x32xf32>
      %32 = math.tanh %31 : vector<2x32xf32>
      %33 = vector.extract_strided_slice %18 {offsets = [0, 96], sizes = [2, 32], strides = [1, 1]} : vector<2x128xf32> to vector<2x32xf32>
      %34 = arith.negf %33 : vector<2x32xf32>
      %35 = math.exp %34 : vector<2x32xf32>
      %cst_17 = arith.constant 1.000000e+00 : f32
      %36 = vector.broadcast %cst_17 : f32 to vector<2x32xf32>
      %37 = arith.addf %36, %35 : vector<2x32xf32>
      %38 = arith.divf %36, %37 : vector<2x32xf32>
      %c0_18 = arith.constant 0 : index
      %c0_19 = arith.constant 0 : index
      %39 = vector.load %arg9[%c0_18, %c0_19] : memref<2x32xf32, #tpu.memory_space<vmem>>, vector<2x32xf32>
      %40 = arith.mulf %30, %39 : vector<2x32xf32>
      %41 = arith.mulf %24, %32 : vector<2x32xf32>
      %42 = arith.addf %40, %41 : vector<2x32xf32>
      %43 = math.tanh %42 : vector<2x32xf32>
      %44 = arith.mulf %38, %43 : vector<2x32xf32>
      %45 = vector.broadcast %13 : i32 to vector<2x1xi32>
      %46 = arith.cmpi slt, %45, %3 : vector<2x1xi32>
      %c0_20 = arith.constant 0 : index
      %c0_21 = arith.constant 0 : index
      %47 = vector.load %arg8[%c0_20, %c0_21] : memref<2x32xf32, #tpu.memory_space<vmem>>, vector<2x32xf32>
      %48 = vector.shape_cast %46 : vector<2x1xi1> to vector<2x1xi1>
      %49 = vector.broadcast %48 : vector<2x1xi1> to vector<2x32xi1>
      %50 = arith.select %49, %44, %47 : vector<2x32xi1>, vector<2x32xf32>
      %c0_22 = arith.constant 0 : index
      %c0_23 = arith.constant 0 : index
      %51 = vector.load %arg8[%c0_22, %c0_23] : memref<2x32xf32, #tpu.memory_space<vmem>>, vector<2x32xf32>
      tpu.vector_store %arg8[%c0_22, %c0_23], %50 {strides = array<i32>} : memref<2x32xf32, #tpu.memory_space<vmem>>, vector<2x32xf32>,
      %c0_24 = arith.constant 0 : index
      %c0_25 = arith.constant 0 : index
      %52 = vector.load %arg9[%c0_24, %c0_25] : memref<2x32xf32, #tpu.memory_space<vmem>>, vector<2x32xf32>
      %53 = vector.shape_cast %46 : vector<2x1xi1> to vector<2x1xi1>
      %54 = vector.broadcast %53 : vector<2x1xi1> to vector<2x32xi1>
      %55 = arith.select %54, %42, %52 : vector<2x32xi1>, vector<2x32xf32>
      %c0_26 = arith.constant 0 : index
      %c0_27 = arith.constant 0 : index
      %56 = vector.load %arg9[%c0_26, %c0_27] : memref<2x32xf32, #tpu.memory_space<vmem>>, vector<2x32xf32>
      tpu.vector_store %arg9[%c0_26, %c0_27], %55 {strides = array<i32>} : memref<2x32xf32, #tpu.memory_space<vmem>>, vector<2x32xf32>,
      %cst_28 = arith.constant 0.000000e+00 : f32
      %57 = vector.shape_cast %46 : vector<2x1xi1> to vector<2x1xi1>
      %58 = vector.broadcast %57 : vector<2x1xi1> to vector<2x32xi1>
      %59 = vector.broadcast %cst_28 : f32 to vector<2x32xf32>
      %60 = arith.select %58, %44, %59 : vector<2x32xi1>, vector<2x32xf32>
      %61 = arith.index_cast %9 : i32 to index
      %c0_29 = arith.constant 0 : index
      %c0_30 = arith.constant 0 : index
      %62 = vector.load %arg6[%61, %c0_29, %c0_30] : memref<8x2x32xf32, #tpu.memory_space<vmem>>, vector<1x2x32xf32>
      %63 = vector.shape_cast %62 : vector<1x2x32xf32> to vector<2x32xf32>
      %64 = vector.shape_cast %60 : vector<2x32xf32> to vector<1x2x32xf32>
      tpu.vector_store %arg6[%61, %c0_29, %c0_30], %64 {strides = array<i32>} : memref<8x2x32xf32, #tpu.memory_space<vmem>>, vector<1x2x32xf32>,
      %c7_i32 = arith.constant 7 : i32
      %65 = arith.subi %c7_i32, %9 : i32
      %66 = arith.index_cast %65 : i32 to index
      %c0_31 = arith.constant 0 : index
      %c0_32 = arith.constant 0 : index
      %67 = vector.load %arg3[%66, %c0_31, %c0_32] : memref<8x2x128xf32, #tpu.memory_space<vmem>>, vector<1x2x128xf32>
      %68 = vector.shape_cast %67 : vector<1x2x128xf32> to vector<2x128xf32>
      %69 = arith.addi %6, %65 : i32
      %c0_33 = arith.constant 0 : index
      %c0_34 = arith.constant 0 : index
      %70 = vector.load %arg10[%c0_33, %c0_34] : memref<2x32xf32, #tpu.memory_space<vmem>>, vector<2x32xf32>
      %71 = arith.truncf %70 : vector<2x32xf32> to vector<2x32xbf16>
      %c0_35 = arith.constant 0 : index
      %c0_36 = arith.constant 0 : index
      %72 = vector.load %arg5[%c0_35, %c0_36] : memref<32x128xbf16, #tpu.memory_space<vmem>>, vector<32x128xbf16>
      %cst_37 = arith.constant dense<0.000000e+00> : vector<2x128xf32>
      %73 = tpu.matmul %71, %72, %cst_37 {dimension_numbers = #tpu.dot_dimension_numbers<[1], [0], [0], [1], [0, 0, 1, 1], [], []>} : vector<2x32xbf16>, vector<32x128xbf16>, vector<2x128xf32> -> vector<2x128xf32>
      %74 = arith.addf %68, %73 : vector<2x128xf32>
      %75 = vector.extract_strided_slice %74 {offsets = [0, 0], sizes = [2, 32], strides = [1, 1]} : vector<2x128xf32> to vector<2x32xf32>
      %76 = arith.negf %75 : vector<2x32xf32>
      %77 = math.exp %76 : vector<2x32xf32>
      %cst_38 = arith.constant 1.000000e+00 : f32
      %78 = vector.broadcast %cst_38 : f32 to vector<2x32xf32>
      %79 = arith.addf %78, %77 : vector<2x32xf32>
      %80 = arith.divf %78, %79 : vector<2x32xf32>
      %81 = vector.extract_strided_slice %74 {offsets = [0, 32], sizes = [2, 32], strides = [1, 1]} : vector<2x128xf32> to vector<2x32xf32>
      %82 = arith.negf %81 : vector<2x32xf32>
      %83 = math.exp %82 : vector<2x32xf32>
      %cst_39 = arith.constant 1.000000e+00 : f32
      %84 = vector.broadcast %cst_39 : f32 to vector<2x32xf32>
      %85 = arith.addf %84, %83 : vector<2x32xf32>
      %86 = arith.divf %84, %85 : vector<2x32xf32>
      %87 = vector.extract_strided_slice %74 {offsets = [0, 64], sizes = [2, 32], strides = [1, 1]} : vector<2x128xf32> to vector<2x32xf32>
      %88 = math.tanh %87 : vector<2x32xf32>
      %89 = vector.extract_strided_slice %74 {offsets = [0, 96], sizes = [2, 32], strides = [1, 1]} : vector<2x128xf32> to vector<2x32xf32>
      %90 = arith.negf %89 : vector<2x32xf32>
      %91 = math.exp %90 : vector<2x32xf32>
      %cst_40 = arith.constant 1.000000e+00 : f32
      %92 = vector.broadcast %cst_40 : f32 to vector<2x32xf32>
      %93 = arith.addf %92, %91 : vector<2x32xf32>
      %94 = arith.divf %92, %93 : vector<2x32xf32>
      %c0_41 = arith.constant 0 : index
      %c0_42 = arith.constant 0 : index
      %95 = vector.load %arg11[%c0_41, %c0_42] : memref<2x32xf32, #tpu.memory_space<vmem>>, vector<2x32xf32>
      %96 = arith.mulf %86, %95 : vector<2x32xf32>
      %97 = arith.mulf %80, %88 : vector<2x32xf32>
      %98 = arith.addf %96, %97 : vector<2x32xf32>
      %99 = math.tanh %98 : vector<2x32xf32>
      %100 = arith.mulf %94, %99 : vector<2x32xf32>
      %101 = vector.broadcast %69 : i32 to vector<2x1xi32>
      %102 = arith.cmpi slt, %101, %3 : vector<2x1xi32>
      %c0_43 = arith.constant 0 : index
      %c0_44 = arith.constant 0 : index
      %103 = vector.load %arg10[%c0_43, %c0_44] : memref<2x32xf32, #tpu.memory_space<vmem>>, vector<2x32xf32>
      %104 = vector.shape_cast %102 : vector<2x1xi1> to vector<2x1xi1>
      %105 = vector.broadcast %104 : vector<2x1xi1> to vector<2x32xi1>
      %106 = arith.select %105, %100, %103 : vector<2x32xi1>, vector<2x32xf32>
      %c0_45 = arith.constant 0 : index
      %c0_46 = arith.constant 0 : index
      %107 = vector.load %arg10[%c0_45, %c0_46] : memref<2x32xf32, #tpu.memory_space<vmem>>, vector<2x32xf32>
      tpu.vector_store %arg10[%c0_45, %c0_46], %106 {strides = array<i32>} : memref<2x32xf32, #tpu.memory_space<vmem>>, vector<2x32xf32>,
      %c0_47 = arith.constant 0 : index
      %c0_48 = arith.constant 0 : index
      %108 = vector.load %arg11[%c0_47, %c0_48] : memref<2x32xf32, #tpu.memory_space<vmem>>, vector<2x32xf32>
      %109 = vector.shape_cast %102 : vector<2x1xi1> to vector<2x1xi1>
      %110 = vector.broadcast %109 : vector<2x1xi1> to vector<2x32xi1>
      %111 = arith.select %110, %98, %108 : vector<2x32xi1>, vector<2x32xf32>
      %c0_49 = arith.constant 0 : index
      %c0_50 = arith.constant 0 : index
      %112 = vector.load %arg11[%c0_49, %c0_50] : memref<2x32xf32, #tpu.memory_space<vmem>>, vector<2x32xf32>
      tpu.vector_store %arg11[%c0_49, %c0_50], %111 {strides = array<i32>} : memref<2x32xf32, #tpu.memory_space<vmem>>, vector<2x32xf32>,
      %cst_51 = arith.constant 0.000000e+00 : f32
      %113 = vector.shape_cast %102 : vector<2x1xi1> to vector<2x1xi1>
      %114 = vector.broadcast %113 : vector<2x1xi1> to vector<2x32xi1>
      %115 = vector.broadcast %cst_51 : f32 to vector<2x32xf32>
      %116 = arith.select %114, %100, %115 : vector<2x32xi1>, vector<2x32xf32>
      %117 = arith.index_cast %65 : i32 to index
      %c0_52 = arith.constant 0 : index
      %c0_53 = arith.constant 0 : index
      %118 = vector.load %arg7[%117, %c0_52, %c0_53] : memref<8x2x32xf32, #tpu.memory_space<vmem>>, vector<1x2x32xf32>
      %119 = vector.shape_cast %118 : vector<1x2x32xf32> to vector<2x32xf32>
      %120 = vector.shape_cast %116 : vector<2x32xf32> to vector<1x2x32xf32>
      tpu.vector_store %arg7[%117, %c0_52, %c0_53], %120 {strides = array<i32>} : memref<8x2x32xf32, #tpu.memory_space<vmem>>, vector<1x2x32xf32>,
    }
    %c8_i32_6 = arith.constant 8 : i32
    return
  }
  func.func @transform_0(%arg0: i32) -> (i32, i32) {
    %c0_i32 = arith.constant 0 : i32
    %c0_i32_0 = arith.constant 0 : i32
    %c0_i32_1 = arith.constant 0 : i32
    return %c0_i32, %c0_i32_0 : i32, i32
  }
  func.func @transform_1(%arg0: i32) -> (i32, i32, i32) {
    %c0_i32 = arith.constant 0 : i32
    %c0_i32_0 = arith.constant 0 : i32
    %c0_i32_1 = arith.constant 0 : i32
    return %arg0, %c0_i32, %c0_i32_0 : i32, i32, i32
  }
  func.func @transform_2(%arg0: i32) -> (i32, i32, i32) {
    %c0_i32 = arith.constant 0 : i32
    %0 = arith.subi %c0_i32, %arg0 : i32
    %c0_i32_0 = arith.constant 0 : i32
    %c0_i32_1 = arith.constant 0 : i32
    %c0_i32_2 = arith.constant 0 : i32
    return %0, %c0_i32_0, %c0_i32_1 : i32, i32, i32
  }
  func.func @transform_3(%arg0: i32) -> (i32, i32) {
    %c0_i32 = arith.constant 0 : i32
    %c0_i32_0 = arith.constant 0 : i32
    %c0_i32_1 = arith.constant 0 : i32
    return %c0_i32, %c0_i32_0 : i32, i32
  }
  func.func @transform_4(%arg0: i32) -> (i32, i32) {
    %c0_i32 = arith.constant 0 : i32
    %c0_i32_0 = arith.constant 0 : i32
    %c0_i32_1 = arith.constant 0 : i32
    return %c0_i32, %c0_i32_0 : i32, i32
  }
  func.func @transform_5(%arg0: i32) -> (i32, i32, i32) {
    %c0_i32 = arith.constant 0 : i32
    %c0_i32_0 = arith.constant 0 : i32
    %c0_i32_1 = arith.constant 0 : i32
    return %arg0, %c0_i32, %c0_i32_0 : i32, i32, i32
  }
  func.func @transform_6(%arg0: i32) -> (i32, i32, i32) {
    %c0_i32 = arith.constant 0 : i32
    %0 = arith.subi %c0_i32, %arg0 : i32
    %c0_i32_0 = arith.constant 0 : i32
    %c0_i32_1 = arith.constant 0 : i32
    %c0_i32_2 = arith.constant 0 : i32
    return %0, %c0_i32_0, %c0_i32_1 : i32, i32, i32
  }
}

module attributes {stable_mosaic.version = 11 : i64} {
  func.func @_classifier_kernel(%arg0: i32, %arg1: memref<16x32xf32, #tpu.memory_space<vmem>>, %arg2: memref<16x32xf32, #tpu.memory_space<vmem>>, %arg3: memref<32x32xbf16, #tpu.memory_space<vmem>>, %arg4: memref<32x32xbf16, #tpu.memory_space<vmem>>, %arg5: memref<1x32xf32, #tpu.memory_space<vmem>>, %arg6: memref<32x128xbf16, #tpu.memory_space<vmem>>, %arg7: memref<1x128xf32, #tpu.memory_space<vmem>>, %arg8: memref<16x128xf32, #tpu.memory_space<vmem>>) attributes {dimension_semantics = [#tpu.dimension_semantics<parallel>], iteration_bounds = array<i64: 1>, scalar_prefetch = 0 : i64, scratch_operands = 0 : i64, tpu.core_type = #tpu.core_type<tc>, window_params = [{transform_indices = @transform_0, window_bounds = array<i64: 16, 32>}, {transform_indices = @transform_1, window_bounds = array<i64: 16, 32>}, {pipeline_mode = #tpu.pipeline_mode<synchronous>, transform_indices = @transform_2, window_bounds = array<i64: 32, 32>}, {pipeline_mode = #tpu.pipeline_mode<synchronous>, transform_indices = @transform_3, window_bounds = array<i64: 32, 32>}, {pipeline_mode = #tpu.pipeline_mode<synchronous>, transform_indices = @transform_4, window_bounds = array<i64: 1, 32>}, {pipeline_mode = #tpu.pipeline_mode<synchronous>, transform_indices = @transform_5, window_bounds = array<i64: 32, 128>}, {pipeline_mode = #tpu.pipeline_mode<synchronous>, transform_indices = @transform_6, window_bounds = array<i64: 1, 128>}, {transform_indices = @transform_7, window_bounds = array<i64: 16, 128>}]} {
    %c0 = arith.constant 0 : index
    %c0_0 = arith.constant 0 : index
    %0 = vector.load %arg1[%c0, %c0_0] : memref<16x32xf32, #tpu.memory_space<vmem>>, vector<16x32xf32>
    %1 = arith.truncf %0 : vector<16x32xf32> to vector<16x32xbf16>
    %c0_1 = arith.constant 0 : index
    %c0_2 = arith.constant 0 : index
    %2 = vector.load %arg3[%c0_1, %c0_2] : memref<32x32xbf16, #tpu.memory_space<vmem>>, vector<32x32xbf16>
    %cst = arith.constant dense<0.000000e+00> : vector<16x32xf32>
    %3 = tpu.matmul %1, %2, %cst {dimension_numbers = #tpu.dot_dimension_numbers<[1], [0], [0], [1], [0, 0, 1, 1], [], []>} : vector<16x32xbf16>, vector<32x32xbf16>, vector<16x32xf32> -> vector<16x32xf32>
    %c0_3 = arith.constant 0 : index
    %c0_4 = arith.constant 0 : index
    %4 = vector.load %arg2[%c0_3, %c0_4] : memref<16x32xf32, #tpu.memory_space<vmem>>, vector<16x32xf32>
    %5 = arith.truncf %4 : vector<16x32xf32> to vector<16x32xbf16>
    %c0_5 = arith.constant 0 : index
    %c0_6 = arith.constant 0 : index
    %6 = vector.load %arg4[%c0_5, %c0_6] : memref<32x32xbf16, #tpu.memory_space<vmem>>, vector<32x32xbf16>
    %cst_7 = arith.constant dense<0.000000e+00> : vector<16x32xf32>
    %7 = tpu.matmul %5, %6, %cst_7 {dimension_numbers = #tpu.dot_dimension_numbers<[1], [0], [0], [1], [0, 0, 1, 1], [], []>} : vector<16x32xbf16>, vector<32x32xbf16>, vector<16x32xf32> -> vector<16x32xf32>
    %8 = arith.addf %3, %7 : vector<16x32xf32>
    %c0_8 = arith.constant 0 : index
    %c0_9 = arith.constant 0 : index
    %9 = vector.load %arg5[%c0_8, %c0_9] : memref<1x32xf32, #tpu.memory_space<vmem>>, vector<1x32xf32>
    %10 = vector.broadcast %9 : vector<1x32xf32> to vector<16x32xf32>
    %11 = arith.addf %8, %10 : vector<16x32xf32>
    %cst_10 = arith.constant 0.000000e+00 : f32
    %12 = vector.broadcast %cst_10 : f32 to vector<16x32xf32>
    %13 = arith.maximumf %11, %12 : vector<16x32xf32>
    %14 = arith.truncf %13 : vector<16x32xf32> to vector<16x32xbf16>
    %c0_11 = arith.constant 0 : index
    %c0_12 = arith.constant 0 : index
    %15 = vector.load %arg6[%c0_11, %c0_12] : memref<32x128xbf16, #tpu.memory_space<vmem>>, vector<32x128xbf16>
    %cst_13 = arith.constant dense<0.000000e+00> : vector<16x128xf32>
    %16 = tpu.matmul %14, %15, %cst_13 {dimension_numbers = #tpu.dot_dimension_numbers<[1], [0], [0], [1], [0, 0, 1, 1], [], []>} : vector<16x32xbf16>, vector<32x128xbf16>, vector<16x128xf32> -> vector<16x128xf32>
    %c0_14 = arith.constant 0 : index
    %c0_15 = arith.constant 0 : index
    %17 = vector.load %arg7[%c0_14, %c0_15] : memref<1x128xf32, #tpu.memory_space<vmem>>, vector<1x128xf32>
    %18 = vector.broadcast %17 : vector<1x128xf32> to vector<16x128xf32>
    %19 = arith.addf %16, %18 : vector<16x128xf32>
    %c0_16 = arith.constant 0 : index
    %c0_17 = arith.constant 0 : index
    %20 = vector.load %arg8[%c0_16, %c0_17] : memref<16x128xf32, #tpu.memory_space<vmem>>, vector<16x128xf32>
    tpu.vector_store %arg8[%c0_16, %c0_17], %19 {strides = array<i32>} : memref<16x128xf32, #tpu.memory_space<vmem>>, vector<16x128xf32>,
    return
  }
  func.func @transform_0(%arg0: i32) -> (i32, i32) {
    %c0_i32 = arith.constant 0 : i32
    %c0_i32_0 = arith.constant 0 : i32
    return %arg0, %c0_i32 : i32, i32
  }
  func.func @transform_1(%arg0: i32) -> (i32, i32) {
    %c0_i32 = arith.constant 0 : i32
    %c0_i32_0 = arith.constant 0 : i32
    return %arg0, %c0_i32 : i32, i32
  }
  func.func @transform_2(%arg0: i32) -> (i32, i32) {
    %c0_i32 = arith.constant 0 : i32
    %c0_i32_0 = arith.constant 0 : i32
    %c0_i32_1 = arith.constant 0 : i32
    return %c0_i32, %c0_i32_0 : i32, i32
  }
  func.func @transform_3(%arg0: i32) -> (i32, i32) {
    %c0_i32 = arith.constant 0 : i32
    %c0_i32_0 = arith.constant 0 : i32
    %c0_i32_1 = arith.constant 0 : i32
    return %c0_i32, %c0_i32_0 : i32, i32
  }
  func.func @transform_4(%arg0: i32) -> (i32, i32) {
    %c0_i32 = arith.constant 0 : i32
    %c0_i32_0 = arith.constant 0 : i32
    %c0_i32_1 = arith.constant 0 : i32
    return %c0_i32, %c0_i32_0 : i32, i32
  }
  func.func @transform_5(%arg0: i32) -> (i32, i32) {
    %c0_i32 = arith.constant 0 : i32
    %c0_i32_0 = arith.constant 0 : i32
    %c0_i32_1 = arith.constant 0 : i32
    return %c0_i32, %c0_i32_0 : i32, i32
  }
  func.func @transform_6(%arg0: i32) -> (i32, i32) {
    %c0_i32 = arith.constant 0 : i32
    %c0_i32_0 = arith.constant 0 : i32
    %c0_i32_1 = arith.constant 0 : i32
    return %c0_i32, %c0_i32_0 : i32, i32
  }
  func.func @transform_7(%arg0: i32) -> (i32, i32) {
    %c0_i32 = arith.constant 0 : i32
    %c0_i32_0 = arith.constant 0 : i32
    return %arg0, %c0_i32 : i32, i32
  }
}

</mosaic_0001>

<bundles_post_ra>
// kernel: importance_predictor_forward.5
= control target key start
LH: loop header
LB: loop body
LE: loop exit
PB: predicated region body
PF: predicated region fallthrough
CT: control target
= control target key end

     0   :  { %10 = vsyncpa [#allocation3], 0  ;;  %s215_s18 = smov [#allocation2]   ;;  %s216_s20 = smov 128   ;;  %s264_s0 = inlined_call_operand.vmem [shape: bf16[16,64], index: 0, kind: input, shape index: {}]   ;;  %s265_s1 = inlined_call_operand.hbm [shape: bf16[64,256], index: 1, kind: input, shape index: {}]   ;;  %s266_s2 = inlined_call_operand.vmem [shape: f32[1,256], index: 2, kind: input, shape index: {}]   ;;  %s267_s3 = inlined_call_operand.vmem [shape: f32[16,128], index: 3, kind: output, shape index: {0}]   ;;  %s268_s4 = inlined_call_operand.vmem [shape: f32[16,128], index: 4, kind: output, shape index: {1}]  }
   0x1   :  { %s17_s17 = sshll.u32 %s265_s1, 4  ;;  %s19_s19 = sshll.u32 %s215_s18, 4  ;;  %s18_s17 = int_to_ptr.hbm [resolvable:$true] %s17_s17  ;;  %s20_s19 = int_to_ptr.vmem [resolvable:$true] %s19_s19 }
   0x2   :  { %s217_s21 = smov 8  }
   0x3   :  { %25 = dma.hbm_to_vmem [thread:$0]  %s18_s17, 1024, %s20_s19, [#allocation3], %s216_s20, %s216_s20, %s217_s21  }
   0x4   :  { %213 = dma.done.wait [#allocation3], 1024  }
   0x5   :  { %214 = vsyncadd [#allocation3], 4294966272  ;;  %v169_v0 = vld [vmem:[#allocation2 + $0x30] sm:$0xf]  ;;  %v185_v1 = vld [vmem:[#allocation2 + $0x34] sm:$0xf0] }
   0x6   :  { %v184_v2 = vld [vmem:[#allocation2 + $0x34] sm:$0xf]  ;;  %v170_v3 = vor.u32 %v185_v1, %v169_v0  ;;  %v171_v4 = vld [vmem:[#allocation2 + $0x38] sm:$0xf0]  ;;  %v161_v5 = vld [vmem:[#allocation2 + $0x20] sm:$0xf] }
   0x7   :  { %v183_v6 = vld [vmem:[#allocation2 + $0x24] sm:$0xf0]  ;;  %v174_v7 = vor.u32 %v184_v2, %v171_v4  ;;  %v182_v8 = vld [vmem:[#allocation2 + $0x24] sm:$0xf]  ;;  %v163_v9 = vld [vmem:[#allocation2 + $0x28] sm:$0xf0] }
   0x8   :  { %102 = vmatpush.bf16.msra.mxu0 %v170_v3  ;;  %v162_v10 = vor.u32 %v183_v6, %v161_v5  ;;  %v166_v11 = vor.u32 %v182_v8, %v163_v9  ;;  %v153_v12 = vld [vmem:[#allocation2 + $0x10] sm:$0xf]  ;;  %v181_v13 = vld [vmem:[#allocation2 + $0x14] sm:$0xf0]  ;;  %v180_v14 = vld [vmem:[#allocation2 + $0x14] sm:$0xf] }
   0x9   :  { %116 = vmatpush.bf16.msra.mxu1 %v174_v7  ;;  %v155_v15 = vld [vmem:[#allocation2 + $0x18] sm:$0xf0]  ;;  %v154_v16 = vor.u32 %v181_v13, %v153_v12  ;;  %v145_v18 = vld [vmem:[#allocation2] sm:$0xf]  ;;  %v179_v19 = vld [vmem:[#allocation2 + $0x4] sm:$0xf0] }
   0xa   :  { %v158_v17 = vor.u32 %v180_v14, %v155_v15  ;;  %v178_v20 = vld [vmem:[#allocation2 + $0x4] sm:$0xf]  ;;  %v147_v21 = vld [vmem:[#allocation2 + $0x8] sm:$0xf0]  ;;  %v146_v22 = vor.u32 %v179_v19, %v145_v18  ;;  %vm94_vm0 = vcmask 523264  }
   0xb   :  { %v150_v23 = vor.u32 %v178_v20, %v147_v21  ;;  %v177_v24 = vld [vmem:[%s264_s0] sm:$0xff] }
   0xc   :  { %103 = vmatpush.bf16.msra.mxu0 %v162_v10  ;;  %v43_v25 = vld [vmem:[%s266_s2] sm:$0x3] }
   0xd   :  { %117 = vmatpush.bf16.msra.mxu1 %v166_v11  ;;  %v45_v26 = vperm.slane %v43_v25, 0  ;;  %v46_v27 = vperm.slane %v43_v25, 1 }
  0x10   :  { %104 = vmatpush.bf16.msra.mxu0 %v154_v16 }
  0x11   :  { %118 = vmatpush.bf16.msra.mxu1 %v158_v17 }
  0x14   :  { %105 = vmatpush.bf16.msra.mxu0 %v146_v22 }
  0x15   :  { %119 = vmatpush.bf16.msra.mxu1 %v150_v23 }
  0x17   :  { %175 = vmatmul.msk.bf16.vlgmr.msra.gmra.mxu0 %vm94_vm0, %v177_v24 }
  0x18   :  { %176 = vmatmul.msk.bf16.vlgmr.msra.gmra.mxu1 %vm94_vm0, %v177_v24 }
  0x94   :  { %v107_v28 = vpop.f32.mrf.mxu0 }
  0x95   :  { %v108_v29 = vadd.f32 %v107_v28, %v45_v26  ;;  %v121_v30 = vpop.f32.mrf.mxu1 }
  0x96   :  { %v122_v31 = vadd.f32 %v121_v30, %v46_v27 }
  0x97   :  { %126 = vst [vmem:[%s267_s3] sm:$0xff] %v108_v29 }
  0x98   :  { %128 = vst [vmem:[%s268_s4] sm:$0xff] %v122_v31 }
  0x9c   :  { %v109_v32 = vpop.f32.mrf.mxu0 }
  0x9d   :  { %v110_v33 = vadd.f32 %v109_v32, %v45_v26  ;;  %v123_v34 = vpop.f32.mrf.mxu1 }
  0x9e   :  { %v124_v35 = vadd.f32 %v123_v34, %v46_v27 }
  0x9f   :  { %127 = vst [vmem:[%s267_s3 + $0x8] sm:$0xff] %v110_v33 }
  0xa0   :  { %129 = vst [vmem:[%s268_s4 + $0x8] sm:$0xff] %v124_v35 }
  0xa1   :  { %138 = vsyncpa [#allocation3], 1 }

// kernel: importance_predictor_forward.7
= control target key start
LH: loop header
LB: loop body
LE: loop exit
PB: predicated region body
PF: predicated region fallthrough
CT: control target
= control target key end

     0   :  { %12 = vsyncpa [#allocation3], 0  ;;  %s252_s24 = smov [#allocation2]   ;;  %s253_s26 = smov 128   ;;  %s344_s0 = inlined_call_operand.vmem [shape: f32[16,32], index: 0, kind: input, shape index: {}]   ;;  %s345_s1 = inlined_call_operand.vmem [shape: f32[16,32], index: 1, kind: input, shape index: {}]   ;;  %s346_s2 = inlined_call_operand.vmem [shape: bf16[32,256], index: 2, kind: input, shape index: {}]   ;;  %s347_s3 = inlined_call_operand.hbm [shape: bf16[32,256], index: 3, kind: input, shape index: {}]   ;;  %s348_s4 = inlined_call_operand.vmem [shape: f32[1,256], index: 4, kind: input, shape index: {}]   ;;  %s349_s5 = inlined_call_operand.vmem [shape: f32[16,128], index: 5, kind: output, shape index: {0}]   ;;  %s350_s6 = inlined_call_operand.vmem [shape: f32[16,128], index: 6, kind: output, shape index: {1}]  }
   0x1   :  { %s23_s23 = sshll.u32 %s347_s3, 4  ;;  %s25_s25 = sshll.u32 %s252_s24, 4  ;;  %s24_s23 = int_to_ptr.hbm [resolvable:$true] %s23_s23  ;;  %s26_s25 = int_to_ptr.vmem [resolvable:$true] %s25_s25 }
   0x2   :  { %s254_s27 = smov 8  }
   0x3   :  { %31 = dma.hbm_to_vmem [thread:$0]  %s24_s23, 512, %s26_s25, [#allocation3], %s253_s26, %s253_s26, %s254_s27  }
   0x4   :  { %250 = dma.done.wait [#allocation3], 512  }
   0x5   :  { %251 = vsyncadd [#allocation3], 4294966784  ;;  %v189_v0 = vld [vmem:[#allocation2 + $0x10] sm:$0xf]  ;;  %v222_v1 = vld [vmem:[#allocation2 + $0x14] sm:$0xf0] }
   0x6   :  { %v221_v2 = vld [vmem:[#allocation2 + $0x14] sm:$0xf]  ;;  %v190_v3 = vor.u32 %v222_v1, %v189_v0  ;;  %v191_v4 = vld [vmem:[#allocation2 + $0x18] sm:$0xf0]  ;;  %v207_v5 = vld [vmem:[%s346_s2 + $0x10] sm:$0xf] }
   0x7   :  { %v218_v6 = vld [vmem:[%s346_s2 + $0x14] sm:$0xf0]  ;;  %v194_v7 = vor.u32 %v221_v2, %v191_v4  ;;  %v217_v9 = vld [vmem:[%s346_s2 + $0x14] sm:$0xf]  ;;  %v209_v10 = vld [vmem:[%s346_s2 + $0x18] sm:$0xf0] }
   0x8   :  { %v208_v8 = vor.u32 %v218_v6, %v207_v5  ;;  %v181_v11 = vld [vmem:[#allocation2] sm:$0xf]  ;;  %83 = vmatpush.bf16.msra.mxu0 %v190_v3  ;;  %v212_v12 = vor.u32 %v217_v9, %v209_v10  ;;  %v220_v13 = vld [vmem:[#allocation2 + $0x4] sm:$0xf0]  ;;  %v219_v14 = vld [vmem:[#allocation2 + $0x4] sm:$0xf] }
   0x9   :  { %v183_v15 = vld [vmem:[#allocation2 + $0x8] sm:$0xf0]  ;;  %97 = vmatpush.bf16.msra.mxu1 %v194_v7  ;;  %v182_v16 = vor.u32 %v220_v13, %v181_v11  ;;  %v199_v18 = vld [vmem:[%s346_s2] sm:$0xf]  ;;  %v216_v19 = vld [vmem:[%s346_s2 + $0x4] sm:$0xf0] }
   0xa   :  { %134 = vmatpush.bf16.msra.mxu2 %v208_v8  ;;  %v186_v17 = vor.u32 %v219_v14, %v183_v15  ;;  %v215_v20 = vld [vmem:[%s346_s2 + $0x4] sm:$0xf]  ;;  %148 = vmatpush.bf16.msra.mxu3 %v212_v12  ;;  %v200_v21 = vor.u32 %v216_v19, %v199_v18  ;;  %v201_v22 = vld [vmem:[%s346_s2 + $0x8] sm:$0xf0]  ;;  %vm73_vm0 = vcmask 261120  }
   0xb   :  { %v46_v23 = vld [vmem:[%s345_s1] sm:$0xff]  ;;  %v47_v24 = vld [vmem:[%s345_s1 + $0x8] sm:$0xff]  ;;  %v204_v25 = vor.u32 %v215_v20, %v201_v22 }
   0xc   :  { %v48_v26 = vpack.c.bf16 %v47_v24, %v46_v23  ;;  %v39_v27 = vld [vmem:[%s344_s0] sm:$0xff]  ;;  %v40_v28 = vld [vmem:[%s344_s0 + $0x8] sm:$0xff]  ;;  %84 = vmatpush.bf16.msra.mxu0 %v182_v16 }
   0xd   :  { %v41_v29 = vpack.c.bf16 %v40_v28, %v39_v27  ;;  %98 = vmatpush.bf16.msra.mxu1 %v186_v17  ;;  %v156_v30 = vld [vmem:[%s348_s4] sm:$0x3] }
   0xe   :  { %135 = vmatpush.bf16.msra.mxu2 %v200_v21  ;;  %149 = vmatpush.bf16.msra.mxu3 %v204_v25  ;;  %v158_v33 = vperm.slane %v156_v30, 0  ;;  %v159_v35 = vperm.slane %v156_v30, 1 }
   0xf   :  { %195 = vmatmul.msk.bf16.vlgmr.msra.gmra.mxu0 %vm73_vm0, %v48_v26 }
  0x10   :  { %196 = vmatmul.msk.bf16.vlgmr.msra.gmra.mxu1 %vm73_vm0, %v48_v26 }
  0x11   :  { %213 = vmatmul.msk.bf16.vlgmr.msra.gmra.mxu2 %vm73_vm0, %v41_v29  ;;  %214 = vmatmul.msk.bf16.vlgmr.msra.gmra.mxu3 %vm73_vm0, %v41_v29 }
  0x8c   :  { %v86_v31 = vpop.f32.mrf.mxu0 }
  0x8d   :  { %v100_v32 = vpop.f32.mrf.mxu1 }
  0x94   :  { %v137_v34 = vpop.f32.mrf.mxu2  ;;  %v151_v37 = vpop.f32.mrf.mxu3 }
  0x95   :  { %v138_v36 = vadd.f32 %v137_v34, %v86_v31  ;;  %v152_v38 = vadd.f32 %v151_v37, %v100_v32  ;;  %v88_v41 = vpop.f32.mrf.mxu0  ;;  %v102_v43 = vpop.f32.mrf.mxu1 }
  0x97   :  { %v162_v39 = vadd.f32 %v158_v33, %v138_v36  ;;  %v163_v40 = vadd.f32 %v159_v35, %v152_v38 }
  0x99   :  { %166 = vst [vmem:[%s349_s5] sm:$0xff] %v162_v39 }
  0x9a   :  { %168 = vst [vmem:[%s350_s6] sm:$0xff] %v163_v40 }
  0x9c   :  { %v139_v42 = vpop.f32.mrf.mxu2  ;;  %v153_v45 = vpop.f32.mrf.mxu3 }
  0x9d   :  { %v140_v44 = vadd.f32 %v139_v42, %v88_v41  ;;  %v154_v46 = vadd.f32 %v153_v45, %v102_v43 }
  0x9f   :  { %v164_v47 = vadd.f32 %v158_v33, %v140_v44  ;;  %v165_v48 = vadd.f32 %v159_v35, %v154_v46 }
  0xa1   :  { %167 = vst [vmem:[%s349_s5 + $0x8] sm:$0xff] %v164_v47 }
  0xa2   :  { %169 = vst [vmem:[%s350_s6 + $0x8] sm:$0xff] %v165_v48 }
  0xa3   :  { %178 = vsyncpa [#allocation3], 1 }

// kernel: importance_predictor_forward.8
= control target key start
LH: loop header
LB: loop body
LE: loop exit
PB: predicated region body
PF: predicated region fallthrough
CT: control target
= control target key end

     0   :  { %12 = vsyncpa [#allocation7], 0  ;;  %s642_s0 = inlined_call_operand.vmem [shape: s32[2,1], index: 0, kind: input, shape index: {}]   ;;  %s643_s1 = inlined_call_operand.vmem [shape: f32[8,2,128], index: 1, kind: input, shape index: {}]   ;;  %s644_s2 = inlined_call_operand.vmem [shape: f32[8,2,128], index: 2, kind: input, shape index: {}]   ;;  %s645_s3 = inlined_call_operand.hbm [shape: bf16[32,128], index: 3, kind: input, shape index: {}]   ;;  %s646_s4 = inlined_call_operand.hbm [shape: bf16[32,128], index: 4, kind: input, shape index: {}]   ;;  %s647_s5 = inlined_call_operand.vmem [shape: f32[8,2,32], index: 5, kind: output, shape index: {0}]   ;;  %s648_s6 = inlined_call_operand.vmem [shape: f32[8,2,32], index: 6, kind: output, shape index: {1}]  }
   0x1   :  { %s32_s23 = sshll.u32 %s645_s3, 4  ;;  %s33_s23 = int_to_ptr.hbm [resolvable:$true] %s32_s23 }
   0x2   :  { %13 = vsyncpa [#allocation9], 0  ;;  %s517_s24 = smov [#allocation6]   ;;  %s45_s28 = sshll.u32 %s646_s4, 4  ;;  %s46_s28 = int_to_ptr.hbm [resolvable:$true] %s45_s28 }
   0x3   :  { %s34_s25 = sshll.u32 %s517_s24, 4  ;;  %s518_s29 = smov 64   ;;  %s35_s25 = int_to_ptr.vmem [resolvable:$true] %s34_s25 }
   0x4   :  { %s519_s30 = smov 4   ;;  %s520_s7 = smov [#allocation8]  }
   0x5   :  { %40 = dma.hbm_to_vmem [thread:$0]  %s33_s23, 256, %s35_s25, [#allocation7], %s518_s29, %s518_s29, %s519_s30  }
   0x6   :  { %s47_s8 = sshll.u32 %s520_s7, 4  ;;  %s48_s8 = int_to_ptr.vmem [resolvable:$true] %s47_s8 }
   0x7   :  { %53 = dma.hbm_to_vmem [thread:$0]  %s46_s28, 256, %s48_s8, [#allocation9], %s518_s29, %s518_s29, %s519_s30  }
   0x8   :  { %509 = dma.done.wait [#allocation7], 256  }
   0x9   :  { %510 = vsyncadd [#allocation7], 4294967040 }
   0xa   :  { %511 = dma.done.wait [#allocation9], 256  }
   0xb   :  { %512 = vsyncadd [#allocation9], 4294967040  ;;  %vm95_vm0 = vcmask 254976   ;;  %v521_v0 = vmov 0.0   ;;  %v574_v1 = vld [vmem:[%s642_s0] sm:$0x3] }
   0xc   :  { %96 = vst.msk [vmem:[#allocation2] sm:$0x3] %vm95_vm0, %v521_v0  ;;  %s576_s9 = smov 0  }
   0xd   :  { %97 = vst.msk [vmem:[#allocation3] sm:$0x3] %vm95_vm0, %v521_v0 }
   0xe   :  { %98 = vst.msk [vmem:[#allocation4] sm:$0x3] %vm95_vm0, %v521_v0 }
   0xf   :  { %99 = vst.msk [vmem:[#allocation5] sm:$0x3] %vm95_vm0, %v521_v0 }
  0x10 LB: > { %v419_v2 = vld [vmem:[#allocation6 + $0x8] sm:$0xff]  ;;  %v421_v3 = vld [vmem:[#allocation8 + $0x8] sm:$0xff]  ;;  %v418_v4 = vld [vmem:[#allocation6] sm:$0xff]  ;;  %s522_s0 = smov 32   ;;  %vm132_vm1 = vcmask 261120   ;;  %s396_s10 = sshll.u32 %s515_s9, 1  ;;  %v192_v53 = vstv %s515_s9  ;;  %s515_s9 = sphi %s576_s9, %s109_s9  }
  0x11   : > { %v420_v5 = vld [vmem:[#allocation8] sm:$0xff]  ;;  %142 = vmatpush.bf16.msra.mxu0 %v419_v2  ;;  %260 = vmatpush.bf16.msra.mxu1 %v421_v3  ;;  %s111_s13 = scalar_lea.vmem %s643_s1, %s396_s10  ;;  %s228_s14 = ssub.s32 7, %s515_s9  ;;  %v525_v29 = vmov 0   ;;  %vm193_vm10 = vcmp.lt.s32.totalorder %v192_v53, %v574_v1 }
  0x12   : > { %v112_v12 = vld [vmem:[%s111_s13] sm:$0x3]  ;;  %s596_s15 = sshll.u32 %s228_s14, 1  ;;  %s523_s19 = smov 64   ;;  %439 = vset.pattern.permute.xlu2 %v525_v29  ;;  %440 = vset.pattern.permute.xlu0 %v525_v29  ;;  %v194_v54 = vsel %vm193_vm10, 1, %v525_v29  ;;  %v310_v3 = vstv %s228_s14 }
  0x13   : > { %v114_v6 = vld [vmem:[#allocation2] sm:$0x3]  ;;  %s230_s18 = scalar_lea.vmem %s644_s2, %s596_s15  ;;  %s524_s20 = smov 96   ;;  %vm311_vm11 = vcmp.lt.s32.totalorder %v310_v3, %v574_v1 }
  0x14   : > { %v170_v8 = vld [vmem:[#allocation3] sm:$0x3]  ;;  %v115_v9 = vpack.c.bf16 %v114_v6, %v114_v6  ;;  %v231_v16 = vld [vmem:[%s230_s18] sm:$0x3]  ;;  %s226_s23 = scalar_lea.vmem %s647_s5, %s396_s10  ;;  %s343_s26 = scalar_lea.vmem %s648_s6, %s596_s15 }
  0x15   : > { %v581_v7 = vld [vmem:[#allocation4] sm:$0x3]  ;;  %172 = vrot.lane.b32.xlu1 %v170_v8, %s522_s0  ;;  %143 = vmatpush.bf16.msra.mxu0 %v418_v4  ;;  %v210_v55 = vld [vmem:[#allocation3] sm:$0x3]  ;;  %v312_v4 = vsel %vm311_vm11, 1, %v525_v29  ;;  %s109_s9 = sadd.s32 1, %s515_s9  }
  0x16   : > { %v234_v10 = vpack.c.bf16 %v581_v7, %v581_v7  ;;  %261 = vmatpush.bf16.msra.mxu1 %v420_v5  ;;  %v288_v11 = vld [vmem:[#allocation5] sm:$0x3]  ;;  %p106_p0 = scmp.ge.s32.totalorder %s109_s9, 8  }
  0x17   : > { %v327_v60 = vld [vmem:[#allocation5] sm:$0x3] }
  0x18   : > { %405 = vmatmul.msk.bf16.vlgmr.msra.gmra.mxu0 %vm132_vm1, %v115_v9 }
  0x19   : > { %416 = vmatmul.msk.bf16.vlgmr.msra.gmra.mxu1 %vm132_vm1, %v234_v10 }
  0x1d   : > { %290 = vrot.lane.b32.xlu1 %v288_v11, %s522_s0 }
  0x25   : > { %200 = vrot.lane.b32.xlu1 %v114_v6, %s524_s20 }
  0x87   : > { %v173_v56 = vpop.permute.xlu1 %172 }
  0x8f   : > { %v291_v61 = vpop.permute.xlu1 %290 }
  0x95   : > { %v145_v13 = vpop.f32.mrf.mxu0 }
  0x96   : > { %v263_v14 = vpop.f32.mrf.mxu1  ;;  %v149_v15 = vadd.f32 %v145_v13, %v112_v12 }
  0x97   : > { %v267_v17 = vadd.f32 %v263_v14, %v231_v16  ;;  %v201_v10 = vpop.permute.xlu1 %200 }
  0x98   : > { %441 = vtanh.f32 %v149_v15  ;;  %v406_v22 = vmul.f32 -1.442695, %v149_v15 }
  0x99   : > { %443 = vtanh.f32 %v267_v17  ;;  %v417_v23 = vmul.f32 -1.442695, %v267_v17 }
  0x9a   : > { %445 = vpow2.f32 %v406_v22 }
  0x9b   : > { %447 = vpow2.f32 %v417_v23 }
  0x9d   : > { %v147_v18 = vpop.f32.mrf.mxu0 }
  0x9e   : > { %v265_v19 = vpop.f32.mrf.mxu1  ;;  %v442_v20 = vpop.eup %441 }
  0x9f   : > { %177 = vrot.lane.b32.xlu0 %v442_v20, %s523_s19  ;;  %v444_v21 = vpop.eup %443 }
  0xa0   : > { %v446_v24 = vpop.eup %445 }
  0xa1   : > { %v153_v25 = vadd.f32 1.0, %v446_v24  ;;  %v448_v26 = vpop.eup %447 }
  0xa2   : > { %v271_v27 = vadd.f32 1.0, %v448_v26 }
  0xa3   : > { %449 = vrcp.f32 %v153_v25  ;;  %v165_v37 = vand.u32 2147483648, %v153_v25  ;;  %vm159_vm3 = vweird.f32 %v153_v25  ;;  %v163_v38 = vand.u32 2147483647, %v153_v25 }
  0xa4   : > { %451 = vrcp.f32 %v271_v27  ;;  %vm277_vm6 = vweird.f32 %v271_v27  ;;  %v283_v46 = vand.u32 2147483648, %v271_v27  ;;  %v281_v47 = vand.u32 2147483647, %v271_v27 }
  0xa5   : > { %v166_v41 = vor.u32 1.1754944e-38, %v165_v37  ;;  %vm164_vm5 = vcmp.eq.f32.partialorder %v163_v38, 8.507059e+37 }
  0xa6   : > { %v284_v49 = vor.u32 1.1754944e-38, %v283_v46  ;;  %vm282_vm9 = vcmp.eq.f32.partialorder %v281_v47, 8.507059e+37 }
  0xa7   : > { %295 = vrot.lane.b32.xlu0 %v444_v21, %s523_s19 }
  0xa9   : > { %v450_v28 = vpop.eup %449 }
  0xaa   : > { %v155_v30 = vmul.f32 %v450_v28, %v153_v25  ;;  %v452_v32 = vpop.eup %451  ;;  %vm160_vm2 = vweird.f32 %v450_v28 }
  0xab   : > { %v273_v34 = vmul.f32 %v452_v32, %v271_v27  ;;  %vm161_vm4 = vmor %vm159_vm3, %vm160_vm2  ;;  %vm278_vm7 = vweird.f32 %v452_v32 }
  0xac   : > { %v156_v31 = vsub.f32 1.0, %v155_v30  ;;  %vm279_vm8 = vmor %vm277_vm6, %vm278_vm7 }
  0xad   : > { %v274_v36 = vsub.f32 1.0, %v273_v34 }
  0xae   : > { %v157_v33 = vmul.f32 %v450_v28, %v156_v31 }
  0xaf   : > { %v275_v40 = vmul.f32 %v452_v32, %v274_v36 }
  0xb0   : > { %v158_v35 = vadd.f32 %v450_v28, %v157_v33 }
  0xb1   : > { %v276_v44 = vadd.f32 %v452_v32, %v275_v40 }
  0xb2   : > { %v162_v39 = vsel %vm161_vm4, %v450_v28, %v158_v35 }
  0xb3   : > { %v167_v42 = vsel %vm164_vm5, %v166_v41, %v162_v39  ;;  %v280_v48 = vsel %vm279_vm8, %v452_v32, %v276_v44 }
  0xb4   : > { %v285_v50 = vsel %vm282_vm9, %v284_v49, %v280_v48  ;;  %v175_v57 = vmul.f32 %v173_v56, %v167_v42 }
  0xb5   : > { %v293_v62 = vmul.f32 %v291_v61, %v285_v50 }
 0x111   : > { %v178_v43 = vpop.permute.xlu0 %177 }
 0x112   : > { %v180_v45 = vmul.f32 %v178_v43, %v167_v42 }
 0x114   : > { %182 = vrot.lane.b32.xlu2 %v180_v45, %s522_s0 }
 0x119   : > { %v296_v51 = vpop.permute.xlu0 %295 }
 0x11a   : > { %v298_v52 = vmul.f32 %v296_v51, %v285_v50 }
 0x11c   : > { %300 = vrot.lane.b32.xlu2 %v298_v52, %s522_s0 }
 0x124   : > { %196 = vperm.xlu2 %439, %v194_v54  }
 0x12c   : > { %212 = vrot.lane.b32.xlu2 %v210_v55, %s522_s0 }
 0x134   : > { %329 = vrot.lane.b32.xlu2 %v327_v60, %s522_s0 }
 0x16e   : > { %v183_v58 = vpop.permute.xlu2 %182 }
 0x16f   : > { %v185_v59 = vadd.f32 %v183_v58, %v175_v57 }
 0x171   : > { %453 = vtanh.f32 %v185_v59 }
 0x176   : > { %v301_v63 = vpop.permute.xlu2 %300 }
 0x177   : > { %v454_v0 = vpop.eup %453  ;;  %v303_v2 = vadd.f32 %v301_v63, %v293_v62 }
 0x178   : > { %188 = vrot.lane.b32.xlu0 %v454_v0, %s523_s19 }
 0x179   : > { %455 = vtanh.f32 %v303_v2 }
 0x17e   : > { %v197_v6 = vpop.permute.xlu2 %196 }
 0x17f   : > { %v456_v5 = vpop.eup %455  ;;  %vm198_vm12 = vcmp.eq.s32.totalorder %v197_v6, 1 }
 0x180   : > { %306 = vrot.lane.b32.xlu1 %v456_v5, %s523_s19  ;;  %314 = vperm.xlu0 %440, %v312_v4  }
 0x186   : > { %v213_v8 = vpop.permute.xlu2 %212 }
 0x187   : > { %v215_v9 = vsel %vm198_vm12, %v185_v59, %v213_v8 }
 0x188   : > { %318 = vrot.lane.b32.xlu1 %v581_v7, %s524_s20 }
 0x18e   : > { %v330_v15 = vpop.permute.xlu2 %329 }
 0x190   : > { %217 = vrot.lane.b32.xlu1 %v215_v9, %s524_s20 }
 0x1ea   : > { %v189_v11 = vpop.permute.xlu0 %188 }
 0x1eb   : > { %v191_v12 = vmul.f32 %v189_v11, %v167_v42 }
 0x1ed   : > { %v221_v13 = vsel %vm198_vm12, %v191_v12, 0.0  ;;  %v203_v14 = vsel %vm198_vm12, %v191_v12, %v201_v10 }
 0x1ee   : > { %223 = vrot.lane.b32.xlu2 %v221_v13, %s522_s0  ;;  %205 = vrot.lane.b32.xlu0 %v203_v14, %s522_s0 }
 0x1f2   : > { %v307_v16 = vpop.permute.xlu1 %306  ;;  %v315_v17 = vpop.permute.xlu0 %314 }
 0x1f3   : > { %v309_v7 = vmul.f32 %v307_v16, %v285_v50  ;;  %vm316_vm13 = vcmp.eq.s32.totalorder %v315_v17, 1 }
 0x1f4   : > { %v332_v18 = vsel %vm316_vm13, %v303_v2, %v330_v15 }
 0x1f5   : > { %334 = vrot.lane.b32.xlu1 %v332_v18, %s524_s20  ;;  %v338_v19 = vsel %vm316_vm13, %v309_v7, 0.0 }
 0x1f6   : > { %340 = vrot.lane.b32.xlu2 %v338_v19, %s522_s0 }
 0x1fa   : > { %v319_v20 = vpop.permute.xlu1 %318 }
 0x1fb   : > { %v321_v21 = vsel %vm316_vm13, %v309_v7, %v319_v20 }
 0x1fc   : > { %323 = vrot.lane.b32.xlu0 %v321_v21, %s522_s0 }
 0x202   : > { %v218_v22 = vpop.permute.xlu1 %217 }
 0x203   : > { %220 = vst.msk [vmem:[#allocation3] sm:$0x3] %vm95_vm0, %v218_v22 }
 0x248   : > { %v224_v23 = vpop.permute.xlu2 %223 }
 0x249   : > { %227 = vst.msk [vmem:[%s226_s23] sm:$0x3] %vm95_vm0, %v224_v23 }
 0x250   : > { %v341_v24 = vpop.permute.xlu2 %340 }
 0x251   : > { %344 = vst.msk [vmem:[%s343_s26] sm:$0x3] %vm95_vm0, %v341_v24 }
 0x260   : > { %v206_v25 = vpop.permute.xlu0 %205 }
 0x261   : > { %209 = vst.msk [vmem:[#allocation2] sm:$0x3] %vm95_vm0, %v206_v25 }
 0x267   : > { %v335_v26 = vpop.permute.xlu1 %334 }
 0x268   : > { %337 = vst.msk [vmem:[#allocation5] sm:$0x3] %vm95_vm0, %v335_v26 }
 0x26b   :  { %108 = sbr.rel (!%p106_p0) target bundleno = 16 (0x10), region = 78 }
 0x26e   : > { %v324_v27 = vpop.permute.xlu0 %323 }
 0x26f   : > { %326 = vst.msk [vmem:[#allocation4] sm:$0x3] %vm95_vm0, %v324_v27 }
 0x270   :  { %367 = vsyncpa [#allocation7], 1 }
 0x271   :  { %368 = vsyncpa [#allocation9], 1 }

// kernel: importance_predictor_forward.6
= control target key start
LH: loop header
LB: loop body
LE: loop exit
PB: predicated region body
PF: predicated region fallthrough
CT: control target
= control target key end

     0   :  { %12 = vsyncpa [#allocation7], 0  ;;  %s473_s24 = smov [#allocation6]   ;;  %s474_s26 = smov 64   ;;  %s600_s0 = inlined_call_operand.vmem [shape: s32[2,1], index: 0, kind: input, shape index: {}]   ;;  %s601_s1 = inlined_call_operand.vmem [shape: f32[8,2,128], index: 1, kind: input, shape index: {}]   ;;  %s602_s2 = inlined_call_operand.vmem [shape: f32[8,2,128], index: 2, kind: input, shape index: {}]   ;;  %s603_s3 = inlined_call_operand.vmem [shape: bf16[32,128], index: 3, kind: input, shape index: {}]   ;;  %s604_s4 = inlined_call_operand.hbm [shape: bf16[32,128], index: 4, kind: input, shape index: {}]   ;;  %s605_s5 = inlined_call_operand.vmem [shape: f32[8,2,32], index: 5, kind: output, shape index: {0}]   ;;  %s606_s6 = inlined_call_operand.vmem [shape: f32[8,2,32], index: 6, kind: output, shape index: {1}]  }
   0x1   :  { %s33_s23 = sshll.u32 %s604_s4, 4  ;;  %s35_s25 = sshll.u32 %s473_s24, 4  ;;  %s34_s23 = int_to_ptr.hbm [resolvable:$true] %s33_s23  ;;  %s36_s25 = int_to_ptr.vmem [resolvable:$true] %s35_s25 }
   0x2   :  { %s475_s27 = smov 4  }
   0x3   :  { %41 = dma.hbm_to_vmem [thread:$0]  %s34_s23, 256, %s36_s25, [#allocation7], %s474_s26, %s474_s26, %s475_s27  }
   0x4   :  { %467 = dma.done.wait [#allocation7], 256  }
   0x5   :  { %468 = vsyncadd [#allocation7], 4294967040  ;;  %vm79_vm0 = vcmask 254976   ;;  %v476_v0 = vmov 0.0   ;;  %v526_v1 = vld [vmem:[%s600_s0] sm:$0x3] }
   0x6   :  { %80 = vst.msk [vmem:[#allocation2] sm:$0x3] %vm79_vm0, %v476_v0  ;;  %s528_s29 = smov 0  }
   0x7   :  { %81 = vst.msk [vmem:[#allocation3] sm:$0x3] %vm79_vm0, %v476_v0 }
   0x8   :  { %82 = vst.msk [vmem:[#allocation4] sm:$0x3] %vm79_vm0, %v476_v0 }
   0x9   :  { %83 = vst.msk [vmem:[#allocation5] sm:$0x3] %vm79_vm0, %v476_v0 }
   0xa LB: > { %v402_v2 = vld [vmem:[%s603_s3 + $0x8] sm:$0xff]  ;;  %v404_v3 = vld [vmem:[#allocation6 + $0x8] sm:$0xff]  ;;  %v401_v4 = vld [vmem:[%s603_s3] sm:$0xff]  ;;  %s477_s0 = smov 32   ;;  %vm116_vm1 = vcmask 261120   ;;  %s379_s10 = sshll.u32 %s471_s29, 1  ;;  %v176_v53 = vstv %s471_s29  ;;  %s471_s29 = sphi %s528_s29, %s93_s29  }
   0xb   : > { %v403_v5 = vld [vmem:[#allocation6] sm:$0xff]  ;;  %126 = vmatpush.bf16.msra.mxu0 %v402_v2  ;;  %244 = vmatpush.bf16.msra.mxu1 %v404_v3  ;;  %s95_s13 = scalar_lea.vmem %s601_s1, %s379_s10  ;;  %s212_s14 = ssub.s32 7, %s471_s29  ;;  %v480_v29 = vmov 0   ;;  %vm177_vm10 = vcmp.lt.s32.totalorder %v176_v53, %v526_v1 }
   0xc   : > { %v96_v12 = vld [vmem:[%s95_s13] sm:$0x3]  ;;  %s554_s15 = sshll.u32 %s212_s14, 1  ;;  %s478_s19 = smov 64   ;;  %421 = vset.pattern.permute.xlu2 %v480_v29  ;;  %422 = vset.pattern.permute.xlu0 %v480_v29  ;;  %v178_v54 = vsel %vm177_vm10, 1, %v480_v29  ;;  %v294_v3 = vstv %s212_s14 }
   0xd   : > { %v98_v6 = vld [vmem:[#allocation2] sm:$0x3]  ;;  %s214_s18 = scalar_lea.vmem %s602_s2, %s554_s15  ;;  %s479_s20 = smov 96   ;;  %vm295_vm11 = vcmp.lt.s32.totalorder %v294_v3, %v526_v1 }
   0xe   : > { %v154_v8 = vld [vmem:[#allocation3] sm:$0x3]  ;;  %v99_v9 = vpack.c.bf16 %v98_v6, %v98_v6  ;;  %v215_v16 = vld [vmem:[%s214_s18] sm:$0x3]  ;;  %s210_s23 = scalar_lea.vmem %s605_s5, %s379_s10  ;;  %s327_s26 = scalar_lea.vmem %s606_s6, %s554_s15 }
   0xf   : > { %v539_v7 = vld [vmem:[#allocation4] sm:$0x3]  ;;  %156 = vrot.lane.b32.xlu1 %v154_v8, %s477_s0  ;;  %127 = vmatpush.bf16.msra.mxu0 %v401_v4  ;;  %v194_v55 = vld [vmem:[#allocation3] sm:$0x3]  ;;  %v296_v4 = vsel %vm295_vm11, 1, %v480_v29  ;;  %s93_s29 = sadd.s32 1, %s471_s29  }
  0x10   : > { %v218_v10 = vpack.c.bf16 %v539_v7, %v539_v7  ;;  %245 = vmatpush.bf16.msra.mxu1 %v403_v5  ;;  %v272_v11 = vld [vmem:[#allocation5] sm:$0x3]  ;;  %p90_p0 = scmp.ge.s32.totalorder %s93_s29, 8  }
  0x11   : > { %v311_v60 = vld [vmem:[#allocation5] sm:$0x3] }
  0x12   : > { %388 = vmatmul.msk.bf16.vlgmr.msra.gmra.mxu0 %vm116_vm1, %v99_v9 }
  0x13   : > { %399 = vmatmul.msk.bf16.vlgmr.msra.gmra.mxu1 %vm116_vm1, %v218_v10 }
  0x17   : > { %274 = vrot.lane.b32.xlu1 %v272_v11, %s477_s0 }
  0x1f   : > { %184 = vrot.lane.b32.xlu1 %v98_v6, %s479_s20 }
  0x81   : > { %v157_v56 = vpop.permute.xlu1 %156 }
  0x89   : > { %v275_v61 = vpop.permute.xlu1 %274 }
  0x8f   : > { %v129_v13 = vpop.f32.mrf.mxu0 }
  0x90   : > { %v247_v14 = vpop.f32.mrf.mxu1  ;;  %v133_v15 = vadd.f32 %v129_v13, %v96_v12 }
  0x91   : > { %v251_v17 = vadd.f32 %v247_v14, %v215_v16  ;;  %v185_v10 = vpop.permute.xlu1 %184 }
  0x92   : > { %423 = vtanh.f32 %v133_v15  ;;  %v389_v22 = vmul.f32 -1.442695, %v133_v15 }
  0x93   : > { %425 = vtanh.f32 %v251_v17  ;;  %v400_v23 = vmul.f32 -1.442695, %v251_v17 }
  0x94   : > { %427 = vpow2.f32 %v389_v22 }
  0x95   : > { %429 = vpow2.f32 %v400_v23 }
  0x97   : > { %v131_v18 = vpop.f32.mrf.mxu0 }
  0x98   : > { %v249_v19 = vpop.f32.mrf.mxu1  ;;  %v424_v20 = vpop.eup %423 }
  0x99   : > { %161 = vrot.lane.b32.xlu0 %v424_v20, %s478_s19  ;;  %v426_v21 = vpop.eup %425 }
  0x9a   : > { %v428_v24 = vpop.eup %427 }
  0x9b   : > { %v137_v25 = vadd.f32 1.0, %v428_v24  ;;  %v430_v26 = vpop.eup %429 }
  0x9c   : > { %v255_v27 = vadd.f32 1.0, %v430_v26 }
  0x9d   : > { %431 = vrcp.f32 %v137_v25  ;;  %v149_v37 = vand.u32 2147483648, %v137_v25  ;;  %vm143_vm3 = vweird.f32 %v137_v25  ;;  %v147_v38 = vand.u32 2147483647, %v137_v25 }
  0x9e   : > { %433 = vrcp.f32 %v255_v27  ;;  %vm261_vm6 = vweird.f32 %v255_v27  ;;  %v267_v46 = vand.u32 2147483648, %v255_v27  ;;  %v265_v47 = vand.u32 2147483647, %v255_v27 }
  0x9f   : > { %v150_v41 = vor.u32 1.1754944e-38, %v149_v37  ;;  %vm148_vm5 = vcmp.eq.f32.partialorder %v147_v38, 8.507059e+37 }
  0xa0   : > { %v268_v49 = vor.u32 1.1754944e-38, %v267_v46  ;;  %vm266_vm9 = vcmp.eq.f32.partialorder %v265_v47, 8.507059e+37 }
  0xa1   : > { %279 = vrot.lane.b32.xlu0 %v426_v21, %s478_s19 }
  0xa3   : > { %v432_v28 = vpop.eup %431 }
  0xa4   : > { %v139_v30 = vmul.f32 %v432_v28, %v137_v25  ;;  %v434_v32 = vpop.eup %433  ;;  %vm144_vm2 = vweird.f32 %v432_v28 }
  0xa5   : > { %v257_v34 = vmul.f32 %v434_v32, %v255_v27  ;;  %vm145_vm4 = vmor %vm143_vm3, %vm144_vm2  ;;  %vm262_vm7 = vweird.f32 %v434_v32 }
  0xa6   : > { %v140_v31 = vsub.f32 1.0, %v139_v30  ;;  %vm263_vm8 = vmor %vm261_vm6, %vm262_vm7 }
  0xa7   : > { %v258_v36 = vsub.f32 1.0, %v257_v34 }
  0xa8   : > { %v141_v33 = vmul.f32 %v432_v28, %v140_v31 }
  0xa9   : > { %v259_v40 = vmul.f32 %v434_v32, %v258_v36 }
  0xaa   : > { %v142_v35 = vadd.f32 %v432_v28, %v141_v33 }
  0xab   : > { %v260_v44 = vadd.f32 %v434_v32, %v259_v40 }
  0xac   : > { %v146_v39 = vsel %vm145_vm4, %v432_v28, %v142_v35 }
  0xad   : > { %v151_v42 = vsel %vm148_vm5, %v150_v41, %v146_v39  ;;  %v264_v48 = vsel %vm263_vm8, %v434_v32, %v260_v44 }
  0xae   : > { %v269_v50 = vsel %vm266_vm9, %v268_v49, %v264_v48  ;;  %v159_v57 = vmul.f32 %v157_v56, %v151_v42 }
  0xaf   : > { %v277_v62 = vmul.f32 %v275_v61, %v269_v50 }
 0x10b   : > { %v162_v43 = vpop.permute.xlu0 %161 }
 0x10c   : > { %v164_v45 = vmul.f32 %v162_v43, %v151_v42 }
 0x10e   : > { %166 = vrot.lane.b32.xlu2 %v164_v45, %s477_s0 }
 0x113   : > { %v280_v51 = vpop.permute.xlu0 %279 }
 0x114   : > { %v282_v52 = vmul.f32 %v280_v51, %v269_v50 }
 0x116   : > { %284 = vrot.lane.b32.xlu2 %v282_v52, %s477_s0 }
 0x11e   : > { %180 = vperm.xlu2 %421, %v178_v54  }
 0x126   : > { %196 = vrot.lane.b32.xlu2 %v194_v55, %s477_s0 }
 0x12e   : > { %313 = vrot.lane.b32.xlu2 %v311_v60, %s477_s0 }
 0x168   : > { %v167_v58 = vpop.permute.xlu2 %166 }
 0x169   : > { %v169_v59 = vadd.f32 %v167_v58, %v159_v57 }
 0x16b   : > { %435 = vtanh.f32 %v169_v59 }
 0x170   : > { %v285_v63 = vpop.permute.xlu2 %284 }
 0x171   : > { %v436_v0 = vpop.eup %435  ;;  %v287_v2 = vadd.f32 %v285_v63, %v277_v62 }
 0x172   : > { %172 = vrot.lane.b32.xlu0 %v436_v0, %s478_s19 }
 0x173   : > { %437 = vtanh.f32 %v287_v2 }
 0x178   : > { %v181_v6 = vpop.permute.xlu2 %180 }
 0x179   : > { %v438_v5 = vpop.eup %437  ;;  %vm182_vm12 = vcmp.eq.s32.totalorder %v181_v6, 1 }
 0x17a   : > { %290 = vrot.lane.b32.xlu1 %v438_v5, %s478_s19  ;;  %298 = vperm.xlu0 %422, %v296_v4  }
 0x180   : > { %v197_v8 = vpop.permute.xlu2 %196 }
 0x181   : > { %v199_v9 = vsel %vm182_vm12, %v169_v59, %v197_v8 }
 0x182   : > { %302 = vrot.lane.b32.xlu1 %v539_v7, %s479_s20 }
 0x188   : > { %v314_v15 = vpop.permute.xlu2 %313 }
 0x18a   : > { %201 = vrot.lane.b32.xlu1 %v199_v9, %s479_s20 }
 0x1e4   : > { %v173_v11 = vpop.permute.xlu0 %172 }
 0x1e5   : > { %v175_v12 = vmul.f32 %v173_v11, %v151_v42 }
 0x1e7   : > { %v205_v13 = vsel %vm182_vm12, %v175_v12, 0.0  ;;  %v187_v14 = vsel %vm182_vm12, %v175_v12, %v185_v10 }
 0x1e8   : > { %207 = vrot.lane.b32.xlu2 %v205_v13, %s477_s0  ;;  %189 = vrot.lane.b32.xlu0 %v187_v14, %s477_s0 }
 0x1ec   : > { %v291_v16 = vpop.permute.xlu1 %290  ;;  %v299_v17 = vpop.permute.xlu0 %298 }
 0x1ed   : > { %v293_v7 = vmul.f32 %v291_v16, %v269_v50  ;;  %vm300_vm13 = vcmp.eq.s32.totalorder %v299_v17, 1 }
 0x1ee   : > { %v316_v18 = vsel %vm300_vm13, %v287_v2, %v314_v15 }
 0x1ef   : > { %318 = vrot.lane.b32.xlu1 %v316_v18, %s479_s20  ;;  %v322_v19 = vsel %vm300_vm13, %v293_v7, 0.0 }
 0x1f0   : > { %324 = vrot.lane.b32.xlu2 %v322_v19, %s477_s0 }
 0x1f4   : > { %v303_v20 = vpop.permute.xlu1 %302 }
 0x1f5   : > { %v305_v21 = vsel %vm300_vm13, %v293_v7, %v303_v20 }
 0x1f6   : > { %307 = vrot.lane.b32.xlu0 %v305_v21, %s477_s0 }
 0x1fc   : > { %v202_v22 = vpop.permute.xlu1 %201 }
 0x1fd   : > { %204 = vst.msk [vmem:[#allocation3] sm:$0x3] %vm79_vm0, %v202_v22 }
 0x242   : > { %v208_v23 = vpop.permute.xlu2 %207 }
 0x243   : > { %211 = vst.msk [vmem:[%s210_s23] sm:$0x3] %vm79_vm0, %v208_v23 }
 0x24a   : > { %v325_v24 = vpop.permute.xlu2 %324 }
 0x24b   : > { %328 = vst.msk [vmem:[%s327_s26] sm:$0x3] %vm79_vm0, %v325_v24 }
 0x25a   : > { %v190_v25 = vpop.permute.xlu0 %189 }
 0x25b   : > { %193 = vst.msk [vmem:[#allocation2] sm:$0x3] %vm79_vm0, %v190_v25 }
 0x261   : > { %v319_v26 = vpop.permute.xlu1 %318 }
 0x262   : > { %321 = vst.msk [vmem:[#allocation5] sm:$0x3] %vm79_vm0, %v319_v26 }
 0x265   :  { %92 = sbr.rel (!%p90_p0) target bundleno = 10 (0xa), region = 74 }
 0x268   : > { %v308_v27 = vpop.permute.xlu0 %307 }
 0x269   : > { %310 = vst.msk [vmem:[#allocation4] sm:$0x3] %vm79_vm0, %v308_v27 }
 0x26a   :  { %351 = vsyncpa [#allocation7], 1 }

// kernel: importance_predictor_forward.9
= control target key start
LH: loop header
LB: loop body
LE: loop exit
PB: predicated region body
PF: predicated region fallthrough
CT: control target
= control target key end

     0   :  { %12 = vsyncpa [#allocation3], 0  ;;  %s442_s0 = inlined_call_operand.vmem [shape: f32[16,32], index: 0, kind: input, shape index: {}]   ;;  %s443_s1 = inlined_call_operand.vmem [shape: f32[16,32], index: 1, kind: input, shape index: {}]   ;;  %s444_s2 = inlined_call_operand.vmem [shape: bf16[32,32], index: 2, kind: input, shape index: {}]   ;;  %s445_s3 = inlined_call_operand.hbm [shape: bf16[32,32], index: 3, kind: input, shape index: {}]   ;;  %s446_s4 = inlined_call_operand.hbm [shape: f32[1,32], index: 4, kind: input, shape index: {}]   ;;  %s447_s5 = inlined_call_operand.hbm [shape: bf16[32,128], index: 5, kind: input, shape index: {}]   ;;  %s448_s6 = inlined_call_operand.hbm [shape: f32[1,128], index: 6, kind: input, shape index: {}]   ;;  %s449_s7 = inlined_call_operand.vmem [shape: f32[16,128], index: 7, kind: output, shape index: {}]  }
   0x1   :  { %13 = vsyncpa [#allocation5], 0  ;;  %s39_s26 = sshll.u32 %s446_s4, 4  ;;  %s40_s26 = int_to_ptr.hbm [resolvable:$true] %s39_s26 }
   0x2   :  { %14 = vsyncpa [#allocation8], 0  ;;  %s357_s27 = smov [#allocation4]   ;;  %s25_s8 = sshll.u32 %s445_s3, 4  ;;  %s26_s8 = int_to_ptr.hbm [resolvable:$true] %s25_s8 }
   0x3   :  { %s41_s28 = sshll.u32 %s357_s27, 4  ;;  %s358_s9 = smov [#allocation2]   ;;  %s42_s28 = int_to_ptr.vmem [resolvable:$true] %s41_s28 }
   0x4   :  { %44 = dma.hbm_to_vmem [thread:$0]  %s40_s26, 16, %s42_s28, [#allocation5]  }
   0x5   :  { %s27_s10 = sshll.u32 %s358_s9, 4  ;;  %s359_s11 = smov 64   ;;  %s28_s10 = int_to_ptr.vmem [resolvable:$true] %s27_s10 }
   0x6   :  { %s360_s12 = smov 4   ;;  %s49_s4 = sshll.u32 %s447_s5, 4  ;;  %s50_s4 = int_to_ptr.hbm [resolvable:$true] %s49_s4 }
   0x7   :  { %33 = dma.hbm_to_vmem [thread:$0]  %s26_s8, 256, %s28_s10, [#allocation3], %s359_s11, %s359_s11, %s360_s12  }
   0x8   :  { %s361_s15 = smov [#allocation6]   ;;  %s63_s3 = sshll.u32 %s448_s6, 4  ;;  %s64_s3 = int_to_ptr.hbm [resolvable:$true] %s63_s3 }
   0x9   :  { %s51_s16 = sshll.u32 %s361_s15, 4  ;;  %s362_s19 = smov [#allocation7]   ;;  %s52_s16 = int_to_ptr.vmem [resolvable:$true] %s51_s16 }
   0xa   :  { %57 = dma.hbm_to_vmem [thread:$0]  %s50_s4, 256, %s52_s16, [#allocation5], %s359_s11, %s359_s11, %s360_s12  }
   0xb   :  { %s65_s20 = sshll.u32 %s362_s19, 4  ;;  %s66_s20 = int_to_ptr.vmem [resolvable:$true] %s65_s20 }
   0xc   :  { %68 = dma.hbm_to_vmem [thread:$0]  %s64_s3, 16, %s66_s20, [#allocation8]  }
   0xd   :  { %351 = dma.done.wait [#allocation3], 256  }
   0xe   :  { %352 = vsyncadd [#allocation3], 4294967040 }
   0xf   :  { %353 = dma.done.wait [#allocation5], 272  }
  0x10   :  { %354 = vsyncadd [#allocation5], 4294967024 }
  0x11   :  { %355 = dma.done.wait [#allocation8], 16  }
  0x12   :  { %356 = vsyncadd [#allocation8], 4294967280  ;;  %v244_v0 = vld [vmem:[#allocation2 + $0x8] sm:$0xff]  ;;  %v243_v2 = vld [vmem:[#allocation2] sm:$0xff]  ;;  %vm112_vm0 = vcmask 261120  }
  0x13   :  { %v242_v1 = vld [vmem:[%s444_s2 + $0x8] sm:$0xff]  ;;  %v241_v3 = vld [vmem:[%s444_s2] sm:$0xff]  ;;  %122 = vmatpush.bf16.msra.mxu0 %v244_v0  ;;  %v245_v11 = vld [vmem:[#allocation6] sm:$0xff] }
  0x14   :  { %v93_v4 = vld [vmem:[%s443_s1] sm:$0xff]  ;;  %v94_v5 = vld [vmem:[%s443_s1 + $0x8] sm:$0xff]  ;;  %151 = vmatpush.bf16.msra.mxu1 %v242_v1  ;;  %v253_v15 = vld [vmem:[#allocation4] ss:$0 sm:$0xff] }
  0x15   :  { %v86_v6 = vld [vmem:[%s442_s0] sm:$0xff]  ;;  %v87_v7 = vld [vmem:[%s442_s0 + $0x8] sm:$0xff]  ;;  %v95_v8 = vpack.c.bf16 %v94_v5, %v93_v4 }
  0x16   :  { %v88_v9 = vpack.c.bf16 %v87_v7, %v86_v6  ;;  %v246_v10 = vld [vmem:[#allocation6 + $0x8] sm:$0xff]  ;;  %v254_v24 = vld [vmem:[#allocation7] ss:$0 sm:$0xff] }
  0x17   :  { %123 = vmatpush.bf16.msra.mxu0 %v243_v2  ;;  %197 = vmatpush.bf16.msra.mxu2 %v246_v10 }
  0x18   :  { %152 = vmatpush.bf16.msra.mxu1 %v241_v3 }
  0x1a   :  { %222 = vmatmul.msk.bf16.vlgmr.msra.gmra.mxu0 %vm112_vm0, %v95_v8 }
  0x1b   :  { %231 = vmatmul.msk.bf16.vlgmr.msra.gmra.mxu1 %vm112_vm0, %v88_v9  ;;  %198 = vmatpush.bf16.msra.mxu2 %v245_v11 }
  0x97   :  { %v125_v12 = vpop.f32.mrf.mxu0 }
  0x98   :  { %v154_v13 = vpop.f32.mrf.mxu1 }
  0x99   :  { %v155_v14 = vadd.f32 %v154_v13, %v125_v12 }
  0x9b   :  { %v163_v18 = vadd.f32 %v253_v15, %v155_v14 }
  0x9d   :  { %v165_v21 = vmax.f32 %v163_v18, 0.0 }
  0x9f   :  { %v127_v16 = vpop.f32.mrf.mxu0 }
  0xa0   :  { %v156_v17 = vpop.f32.mrf.mxu1 }
  0xa1   :  { %v157_v19 = vadd.f32 %v156_v17, %v127_v16 }
  0xa3   :  { %v164_v20 = vadd.f32 %v253_v15, %v157_v19 }
  0xa5   :  { %v166_v22 = vmax.f32 %v164_v20, 0.0 }
  0xa7   :  { %v167_v23 = vpack.c.bf16 %v166_v22, %v165_v21 }
  0xa9   :  { %240 = vmatmul.msk.bf16.vlgmr.msra.gmra.mxu2 %vm112_vm0, %v167_v23 }
 0x12c   :  { %v200_v25 = vpop.f32.mrf.mxu2 }
 0x12d   :  { %v201_v26 = vadd.f32 %v254_v24, %v200_v25 }
 0x12f   :  { %205 = vst [vmem:[%s449_s7] sm:$0xff] %v201_v26 }
 0x134   :  { %v202_v27 = vpop.f32.mrf.mxu2 }
 0x135   :  { %v203_v28 = vadd.f32 %v254_v24, %v202_v27 }
 0x137   :  { %206 = vst [vmem:[%s449_s7 + $0x8] sm:$0xff] %v203_v28 }
 0x138   :  { %211 = vsyncpa [#allocation3], 1 }
 0x139   :  { %212 = vsyncpa [#allocation5], 1 }
 0x13a   :  { %213 = vsyncpa [#allocation8], 1 }

</bundles_post_ra>
